<compile_context>
chip_gen: v7x
topology: tpu7x:2x2x1
jax: 0.10.0
libtpu: 0.0.40
codegen_flags: <defaults>
</compile_context>

<pallas_src>
import functools

import jax
import jax.numpy as jnp
from jax import lax
from jax.experimental import pallas as pl
from jax.experimental.pallas import tpu as pltpu

LN_EPS = 1e-5  # nn.LayerNorm default


def _round_up_lanes(n, lane=128):
    return ((n + lane - 1) // lane) * lane


# ----------------------------- in-kernel helpers -----------------------------

def _layernorm_padded(x, g, b, inv_d):
    # x is exactly 0 in the padded lanes, so sum(x)*inv_d and sum(x*x)*inv_d are
    # the exact mean / E[x^2] over the real (un-padded) feature dim.  g and b are
    # zero-padded, so the padded lanes of the result stay exactly 0.
    mu = jnp.sum(x, axis=-1, keepdims=True) * inv_d
    ex2 = jnp.sum(x * x, axis=-1, keepdims=True) * inv_d
    var = ex2 - mu * mu
    return (x - mu) * lax.rsqrt(var + LN_EPS) * g + b


def _gelu_tanh(x):
    # tanh-approx GELU (|err| vs exact erf GELU ~3e-4); tanh lowers to the EUP,
    # which has its own VLIW slot.
    c = 0.7978845608028654  # sqrt(2/pi)
    return 0.5 * x * (1.0 + jnp.tanh(c * (x + 0.044715 * x * x * x)))


# --------------------------------- kernel ------------------------------------

def transformer_kernel(x_ref, attn2_ref, hmask_ref, ggt_ref,
                       ln1_g_ref, ln1_b_ref,
                       wq_ref, wk_ref, wv_ref, wt_ref,
                       wov_ref, wot_ref, bo_ref,
                       ln2_g_ref, ln2_b_ref,
                       w1_ref, b1_ref, w2_ref, b2_ref,
                       o_ref, *, depth, heads, dim_head, dim):
    scale = dim_head ** (-0.5)
    inv_d = 1.0 / dim

    x = x_ref[0]              # (N, Dp) f32, one batch element (grid axis 0)
    attn2 = attn2_ref[...]    # (N, N)   distance-decay matrix (precomputed)
    hmask = hmask_ref[...]    # (heads*N, inner) 0/1 head selector
    ggt = ggt_ref[...]        # (heads*N, heads*N) same-head group-sum matrix

    for l in range(depth):    # static unroll over layers (small depth)
        # ---------------- PreNorm(Attention) + residual ----------------
        xn = _layernorm_padded(x, ln1_g_ref[l], ln1_b_ref[l], inv_d)
        # pre-split projections: every output starts at lane offset 0 (no slicing)
        q = jnp.dot(xn, wq_ref[l], preferred_element_type=jnp.float32)  # (N, inner)
        k = jnp.dot(xn, wk_ref[l], preferred_element_type=jnp.float32)
        v = jnp.dot(xn, wv_ref[l], preferred_element_type=jnp.float32)
        t = jnp.dot(xn, wt_ref[l], preferred_element_type=jnp.float32)

        # All heads at once: block-diagonal K/V stacks — row h*N+m of k_stack is
        # k[m] masked to head h's feature block.  Sublane concat + VPU mask, no
        # per-head loop and no narrow lane slices.
        k_stack = jnp.concatenate([k] * heads, axis=0) * hmask   # (heads*N, inner)
        v_stack = jnp.concatenate([v] * heads, axis=0) * hmask

        # dots[n, h*N+m] = q_h[n] . k_h[m]   -> one MXU pass for all heads
        dots = lax.dot_general(q, k_stack, (((1,), (1,)), ((), ())),
                               preferred_element_type=jnp.float32) * scale  # (N, heads*N)
        m = jnp.max(dots, axis=-1, keepdims=True)   # row max: valid per-head stabilizer
        e = jnp.exp(dots - m)
        # per-head softmax denominators, broadcast back across each head's N columns
        denom = jnp.dot(e, ggt, preferred_element_type=jnp.float32)
        p = e * pl.reciprocal(denom, approx=True)
        out_sm = jnp.dot(p, v_stack, preferred_element_type=jnp.float32)   # (N, inner)

        # head-independent distance-decay branch
        out_t = jnp.dot(attn2, t, preferred_element_type=jnp.float32)      # (N, inner)

        # out-projection, split (host-side) into v-rows / t-rows, outputs lane-dense
        y = jnp.dot(out_sm, wov_ref[l], preferred_element_type=jnp.float32)
        y = y + jnp.dot(out_t, wot_ref[l], preferred_element_type=jnp.float32)
        x = y + bo_ref[l] + x            # to_out bias + residual

        # ---------------- PreNorm(FeedForward) + residual ----------------
        xn2 = _layernorm_padded(x, ln2_g_ref[l], ln2_b_ref[l], inv_d)
        h = jnp.dot(xn2, w1_ref[l], preferred_element_type=jnp.float32) + b1_ref[l]
        h = _gelu_tanh(h)
        x = jnp.dot(h, w2_ref[l], preferred_element_type=jnp.float32) + b2_ref[l] + x

    o_ref[0] = x.astype(o_ref.dtype)


# ------------------------------ pallas wrapper --------------------------------

def transformer_pallas(x, params, *, heads, dim_head):
    B, N, D = x.shape
    depth = params["w_qkvt"].shape[0]
    inner = heads * dim_head
    H = params["w1"].shape[-1]
    Dp = _round_up_lanes(D)      # lane-dense model dim
    Hp = _round_up_lanes(H)      # lane-dense FF hidden dim
    f32 = jnp.float32

    def pad_last(a, target):
        return jnp.pad(a, [(0, 0)] * (a.ndim - 1) + [(0, target - a.shape[-1])])

    def pad_axis(a, axis, target):
        cfg = [(0, 0)] * a.ndim
        cfg[axis] = (0, target - a.shape[axis])
        return jnp.pad(a, cfg)

    # zero-padded activations (padded lanes stay exactly 0 through all layers)
    xp = pad_last(x, Dp)

    # distance-decay matrix with the torch broadcasting quirk (divide column j by
    # the sum of row j; symmetric so identical to row normalization) — (N, N) only.
    idx = jnp.arange(1, N + 1, dtype=f32)
    a2 = jnp.exp(-jnp.abs(idx[None, :] - idx[:, None]) / jnp.exp(1.0))
    attn2 = a2 / a2.sum(-1)

    # constants for the all-heads-at-once attention
    row_head = jnp.arange(heads * N) // N
    col_head = jnp.arange(inner) // dim_head
    hmask = (row_head[:, None] == col_head[None, :]).astype(f32)   # (heads*N, inner)
    ggt = (row_head[:, None] == row_head[None, :]).astype(f32)     # (heads*N, heads*N)

    # per-layer weights: pre-split qkvt, pre-split out-projection, zero-padded
    wq, wk, wv, wt = jnp.split(params["w_qkvt"], 4, axis=-1)       # each (depth, D, inner)
    wq, wk, wv, wt = (pad_axis(w, 1, Dp) for w in (wq, wk, wv, wt))

    w3 = params["w_out"].reshape(depth, heads, 2, dim_head, D)
    w_ov = pad_last(w3[:, :, 0].reshape(depth, inner, D), Dp)      # softmax-branch rows
    w_ot = pad_last(w3[:, :, 1].reshape(depth, inner, D), Dp)      # decay-branch rows

    ln1_g = pad_last(params["ln1_g"], Dp)
    ln1_b = pad_last(params["ln1_b"], Dp)
    b_out = pad_last(params["b_out"], Dp)
    ln2_g = pad_last(params["ln2_g"], Dp)
    ln2_b = pad_last(params["ln2_b"], Dp)
    w1 = pad_last(pad_axis(params["w1"], 1, Dp), Hp)               # (depth, Dp, Hp)
    b1 = pad_last(params["b1"], Hp)
    w2 = pad_last(pad_axis(params["w2"], 1, Hp), Dp)               # (depth, Hp, Dp)
    b2 = pad_last(params["b2"], Dp)

    inputs = (xp, attn2, hmask, ggt,
              ln1_g, ln1_b, wq, wk, wv, wt, w_ov, w_ot, b_out,
              ln2_g, ln2_b, w1, b1, w2, b2)

    def invariant_spec(a):
        nd = a.ndim
        return pl.BlockSpec(a.shape, lambda b, _nd=nd: (0,) * _nd)

    in_specs = ([pl.BlockSpec((1, N, Dp), lambda b: (b, 0, 0))]
                + [invariant_spec(a) for a in inputs[1:]])

    kernel = functools.partial(transformer_kernel, depth=depth, heads=heads,
                               dim_head=dim_head, dim=D)

    out = pl.pallas_call(
        kernel,
        out_shape=jax.ShapeDtypeStruct((B, N, Dp), x.dtype),
        grid=(B,),
        in_specs=in_specs,
        out_specs=pl.BlockSpec((1, N, Dp), lambda b: (b, 0, 0)),
        compiler_params=pltpu.CompilerParams(dimension_semantics=("parallel",)),
    )(*inputs)
    return out[:, :, :D]


# ------------------------------ parameter init ---------------------------------

def init_params(key, dim, depth, heads, dim_head, ff_hdim):
    inner = heads * dim_head
    ks = jax.random.split(key, 6)
    nrm = jax.random.normal
    return dict(
        ln1_g=jnp.ones((depth, 1, dim), jnp.float32),
        ln1_b=jnp.zeros((depth, 1, dim), jnp.float32),
        w_qkvt=0.02 * nrm(ks[0], (depth, dim, 4 * inner), jnp.float32),
        w_out=0.02 * nrm(ks[1], (depth, 2 * inner, dim), jnp.float32),
        b_out=0.01 * nrm(ks[2], (depth, 1, dim), jnp.float32),
        ln2_g=jnp.ones((depth, 1, dim), jnp.float32),
        ln2_b=jnp.zeros((depth, 1, dim), jnp.float32),
        w1=0.02 * nrm(ks[3], (depth, dim, ff_hdim), jnp.float32),
        b1=0.01 * nrm(ks[4], (depth, 1, ff_hdim), jnp.float32),
        w2=0.02 * nrm(ks[5], (depth, ff_hdim, dim), jnp.float32),
        b2=jnp.zeros((depth, 1, dim), jnp.float32),
    )


# ------------------------------ pure-JAX reference -----------------------------

def _ln_ref(x, g, b):
    mu = jnp.mean(x, axis=-1, keepdims=True)
    var = jnp.mean((x - mu) ** 2, axis=-1, keepdims=True)
    return (x - mu) * jax.lax.rsqrt(var + LN_EPS) * g + b


def _ref_transformer(x, p, heads, dim_head):
    B, N, D = x.shape
    depth = p["w_qkvt"].shape[0]
    inner = heads * dim_head
    for l in range(depth):
        xn = _ln_ref(x, p["ln1_g"][l, 0], p["ln1_b"][l, 0])
        qkvt = xn @ p["w_qkvt"][l]
        q, k, v, t = jnp.split(qkvt, 4, axis=-1)
        to_h = lambda z: z.reshape(B, N, heads, dim_head).transpose(0, 2, 1, 3)
        q, k, v, t = map(to_h, (q, k, v, t))
        dots = jnp.einsum("bhnd,bhmd->bhnm", q, k) * dim_head ** (-0.5)
        attn1 = jax.nn.softmax(dots, axis=-1)
        idx = jnp.arange(1, N + 1, dtype=jnp.float32)
        attn2 = jnp.exp(-jnp.abs(idx[None, :] - idx[:, None]) / jnp.exp(1.0))
        attn2 = attn2 / attn2.sum(-1)                 # same broadcast quirk as torch
        out1 = jnp.einsum("bhnm,bhmd->bhnd", attn1, v)
        out2 = jnp.einsum("nm,bhmd->bhnd", attn2, t)
        out = jnp.concatenate([out1, out2], axis=-1)  # (b,h,n,2*dh)
        out = out.transpose(0, 2, 1, 3).reshape(B, N, 2 * inner)
        x = out @ p["w_out"][l] + p["b_out"][l, 0] + x
        xn2 = _ln_ref(x, p["ln2_g"][l, 0], p["ln2_b"][l, 0])
        h = jax.nn.gelu(xn2 @ p["w1"][l] + p["b1"][l, 0], approximate=False)
        x = h @ p["w2"][l] + p["b2"][l, 0] + x
    return x


# ------------------------------------ main -------------------------------------

if __name__ == "__main__":
    B, N, DIM = 2, 8, 32
    DEPTH, HEADS, DIM_HEAD, FF_HDIM = 2, 4, 8, 64

    root = jax.random.PRNGKey(0)
    kx, kp = jax.random.split(root)
    x = jax.random.normal(kx, (B, N, DIM), jnp.float32)
    params = init_params(kp, DIM, DEPTH, HEADS, DIM_HEAD, FF_HDIM)

    y = transformer_pallas(x, params, heads=HEADS, dim_head=DIM_HEAD)
    y = jax.block_until_ready(y)

    y_ref = _ref_transformer(x, params, HEADS, DIM_HEAD)
    assert y.shape == (B, N, DIM)
    assert jnp.allclose(y, y_ref, atol=2e-3, rtol=2e-3), "mismatch vs pure-JAX reference"

    print("KERNEL_OK")
</pallas_src>

<mosaic_0001>
module attributes {stable_mosaic.version = 11 : i64} {
  func.func @transformer_kernel(%arg0: i32, %arg1: memref<1x8x128xf32, #tpu.memory_space<vmem>>, %arg2: memref<8x8xf32, #tpu.memory_space<vmem>>, %arg3: memref<32x32xf32, #tpu.memory_space<vmem>>, %arg4: memref<32x32xf32, #tpu.memory_space<vmem>>, %arg5: memref<2x1x128xf32, #tpu.memory_space<vmem>>, %arg6: memref<2x1x128xf32, #tpu.memory_space<vmem>>, %arg7: memref<2x128x32xf32, #tpu.memory_space<vmem>>, %arg8: memref<2x128x32xf32, #tpu.memory_space<vmem>>, %arg9: memref<2x128x32xf32, #tpu.memory_space<vmem>>, %arg10: memref<2x128x32xf32, #tpu.memory_space<vmem>>, %arg11: memref<2x32x128xf32, #tpu.memory_space<vmem>>, %arg12: memref<2x32x128xf32, #tpu.memory_space<vmem>>, %arg13: memref<2x1x128xf32, #tpu.memory_space<vmem>>, %arg14: memref<2x1x128xf32, #tpu.memory_space<vmem>>, %arg15: memref<2x1x128xf32, #tpu.memory_space<vmem>>, %arg16: memref<2x128x128xf32, #tpu.memory_space<vmem>>, %arg17: memref<2x1x128xf32, #tpu.memory_space<vmem>>, %arg18: memref<2x128x128xf32, #tpu.memory_space<vmem>>, %arg19: memref<2x1x128xf32, #tpu.memory_space<vmem>>, %arg20: memref<1x8x128xf32, #tpu.memory_space<vmem>>) attributes {dimension_semantics = [#tpu.dimension_semantics<parallel>], iteration_bounds = array<i64: 2>, scalar_prefetch = 0 : i64, scratch_operands = 0 : i64, tpu.core_type = #tpu.core_type<tc>, window_params = [{transform_indices = @transform_0, window_bounds = array<i64: 1, 8, 128>}, {pipeline_mode = #tpu.pipeline_mode<synchronous>, transform_indices = @transform_1, window_bounds = array<i64: 8, 8>}, {pipeline_mode = #tpu.pipeline_mode<synchronous>, transform_indices = @transform_2, window_bounds = array<i64: 32, 32>}, {pipeline_mode = #tpu.pipeline_mode<synchronous>, transform_indices = @transform_3, window_bounds = array<i64: 32, 32>}, {pipeline_mode = #tpu.pipeline_mode<synchronous>, transform_indices = @transform_4, window_bounds = array<i64: 2, 1, 128>}, {pipeline_mode = #tpu.pipeline_mode<synchronous>, transform_indices = @transform_5, window_bounds = array<i64: 2, 1, 128>}, {pipeline_mode = #tpu.pipeline_mode<synchronous>, transform_indices = @transform_6, window_bounds = array<i64: 2, 128, 32>}, {pipeline_mode = #tpu.pipeline_mode<synchronous>, transform_indices = @transform_7, window_bounds = array<i64: 2, 128, 32>}, {pipeline_mode = #tpu.pipeline_mode<synchronous>, transform_indices = @transform_8, window_bounds = array<i64: 2, 128, 32>}, {pipeline_mode = #tpu.pipeline_mode<synchronous>, transform_indices = @transform_9, window_bounds = array<i64: 2, 128, 32>}, {pipeline_mode = #tpu.pipeline_mode<synchronous>, transform_indices = @transform_10, window_bounds = array<i64: 2, 32, 128>}, {pipeline_mode = #tpu.pipeline_mode<synchronous>, transform_indices = @transform_11, window_bounds = array<i64: 2, 32, 128>}, {pipeline_mode = #tpu.pipeline_mode<synchronous>, transform_indices = @transform_12, window_bounds = array<i64: 2, 1, 128>}, {pipeline_mode = #tpu.pipeline_mode<synchronous>, transform_indices = @transform_13, window_bounds = array<i64: 2, 1, 128>}, {pipeline_mode = #tpu.pipeline_mode<synchronous>, transform_indices = @transform_14, window_bounds = array<i64: 2, 1, 128>}, {pipeline_mode = #tpu.pipeline_mode<synchronous>, transform_indices = @transform_15, window_bounds = array<i64: 2, 128, 128>}, {pipeline_mode = #tpu.pipeline_mode<synchronous>, transform_indices = @transform_16, window_bounds = array<i64: 2, 1, 128>}, {pipeline_mode = #tpu.pipeline_mode<synchronous>, transform_indices = @transform_17, window_bounds = array<i64: 2, 128, 128>}, {pipeline_mode = #tpu.pipeline_mode<synchronous>, transform_indices = @transform_18, window_bounds = array<i64: 2, 1, 128>}, {transform_indices = @transform_19, window_bounds = array<i64: 1, 8, 128>}]} {
    %c0 = arith.constant 0 : index
    %c0_0 = arith.constant 0 : index
    %c0_1 = arith.constant 0 : index
    %0 = vector.load %arg1[%c0, %c0_0, %c0_1] : memref<1x8x128xf32, #tpu.memory_space<vmem>>, vector<1x8x128xf32>
    %1 = vector.shape_cast %0 : vector<1x8x128xf32> to vector<8x128xf32>
    %c0_2 = arith.constant 0 : index
    %c0_3 = arith.constant 0 : index
    %2 = vector.load %arg2[%c0_2, %c0_3] : memref<8x8xf32, #tpu.memory_space<vmem>>, vector<8x8xf32>
    %c0_4 = arith.constant 0 : index
    %c0_5 = arith.constant 0 : index
    %3 = vector.load %arg3[%c0_4, %c0_5] : memref<32x32xf32, #tpu.memory_space<vmem>>, vector<32x32xf32>
    %c0_6 = arith.constant 0 : index
    %c0_7 = arith.constant 0 : index
    %4 = vector.load %arg4[%c0_6, %c0_7] : memref<32x32xf32, #tpu.memory_space<vmem>>, vector<32x32xf32>
    %c0_8 = arith.constant 0 : index
    %c0_9 = arith.constant 0 : index
    %c0_10 = arith.constant 0 : index
    %5 = vector.load %arg5[%c0_8, %c0_9, %c0_10] : memref<2x1x128xf32, #tpu.memory_space<vmem>>, vector<1x1x128xf32>
    %6 = vector.shape_cast %5 : vector<1x1x128xf32> to vector<1x128xf32>
    %c0_11 = arith.constant 0 : index
    %c0_12 = arith.constant 0 : index
    %c0_13 = arith.constant 0 : index
    %7 = vector.load %arg6[%c0_11, %c0_12, %c0_13] : memref<2x1x128xf32, #tpu.memory_space<vmem>>, vector<1x1x128xf32>
    %8 = vector.shape_cast %7 : vector<1x1x128xf32> to vector<1x128xf32>
    %cst = arith.constant dense<0.000000e+00> : vector<8xf32>
    %9 = vector.multi_reduction <add>, %1, %cst [1] : vector<8x128xf32> to vector<8xf32>
    %10 = vector.shape_cast %9 : vector<8xf32> to vector<8x1xf32>
    %cst_14 = arith.constant 3.125000e-02 : f32
    %11 = vector.broadcast %cst_14 : f32 to vector<8x1xf32>
    %12 = arith.mulf %10, %11 : vector<8x1xf32>
    %13 = arith.mulf %1, %1 : vector<8x128xf32>
    %cst_15 = arith.constant dense<0.000000e+00> : vector<8xf32>
    %14 = vector.multi_reduction <add>, %13, %cst_15 [1] : vector<8x128xf32> to vector<8xf32>
    %15 = vector.shape_cast %14 : vector<8xf32> to vector<8x1xf32>
    %cst_16 = arith.constant 3.125000e-02 : f32
    %16 = vector.broadcast %cst_16 : f32 to vector<8x1xf32>
    %17 = arith.mulf %15, %16 : vector<8x1xf32>
    %18 = arith.mulf %12, %12 : vector<8x1xf32>
    %19 = arith.subf %17, %18 : vector<8x1xf32>
    %20 = vector.broadcast %12 : vector<8x1xf32> to vector<8x128xf32>
    %21 = arith.subf %1, %20 : vector<8x128xf32>
    %cst_17 = arith.constant 9.99999974E-6 : f32
    %22 = vector.broadcast %cst_17 : f32 to vector<8x1xf32>
    %23 = arith.addf %19, %22 : vector<8x1xf32>
    %24 = math.rsqrt %23 : vector<8x1xf32>
    %25 = vector.broadcast %24 : vector<8x1xf32> to vector<8x128xf32>
    %26 = arith.mulf %21, %25 : vector<8x128xf32>
    %27 = vector.broadcast %6 : vector<1x128xf32> to vector<8x128xf32>
    %28 = arith.mulf %26, %27 : vector<8x128xf32>
    %29 = vector.broadcast %8 : vector<1x128xf32> to vector<8x128xf32>
    %30 = arith.addf %28, %29 : vector<8x128xf32>
    %c0_18 = arith.constant 0 : index
    %c0_19 = arith.constant 0 : index
    %c0_20 = arith.constant 0 : index
    %31 = vector.load %arg7[%c0_18, %c0_19, %c0_20] : memref<2x128x32xf32, #tpu.memory_space<vmem>>, vector<1x128x32xf32>
    %32 = vector.shape_cast %31 : vector<1x128x32xf32> to vector<128x32xf32>
    %cst_21 = arith.constant dense<0.000000e+00> : vector<8x32xf32>
    %33 = tpu.matmul %30, %32, %cst_21 {dimension_numbers = #tpu.dot_dimension_numbers<[1], [0], [0], [1], [0, 0, 1, 1], [], []>} : vector<8x128xf32>, vector<128x32xf32>, vector<8x32xf32> -> vector<8x32xf32>
    %c0_22 = arith.constant 0 : index
    %c0_23 = arith.constant 0 : index
    %c0_24 = arith.constant 0 : index
    %34 = vector.load %arg8[%c0_22, %c0_23, %c0_24] : memref<2x128x32xf32, #tpu.memory_space<vmem>>, vector<1x128x32xf32>
    %35 = vector.shape_cast %34 : vector<1x128x32xf32> to vector<128x32xf32>
    %cst_25 = arith.constant dense<0.000000e+00> : vector<8x32xf32>
    %36 = tpu.matmul %30, %35, %cst_25 {dimension_numbers = #tpu.dot_dimension_numbers<[1], [0], [0], [1], [0, 0, 1, 1], [], []>} : vector<8x128xf32>, vector<128x32xf32>, vector<8x32xf32> -> vector<8x32xf32>
    %c0_26 = arith.constant 0 : index
    %c0_27 = arith.constant 0 : index
    %c0_28 = arith.constant 0 : index
    %37 = vector.load %arg9[%c0_26, %c0_27, %c0_28] : memref<2x128x32xf32, #tpu.memory_space<vmem>>, vector<1x128x32xf32>
    %38 = vector.shape_cast %37 : vector<1x128x32xf32> to vector<128x32xf32>
    %cst_29 = arith.constant dense<0.000000e+00> : vector<8x32xf32>
    %39 = tpu.matmul %30, %38, %cst_29 {dimension_numbers = #tpu.dot_dimension_numbers<[1], [0], [0], [1], [0, 0, 1, 1], [], []>} : vector<8x128xf32>, vector<128x32xf32>, vector<8x32xf32> -> vector<8x32xf32>
    %c0_30 = arith.constant 0 : index
    %c0_31 = arith.constant 0 : index
    %c0_32 = arith.constant 0 : index
    %40 = vector.load %arg10[%c0_30, %c0_31, %c0_32] : memref<2x128x32xf32, #tpu.memory_space<vmem>>, vector<1x128x32xf32>
    %41 = vector.shape_cast %40 : vector<1x128x32xf32> to vector<128x32xf32>
    %cst_33 = arith.constant dense<0.000000e+00> : vector<8x32xf32>
    %42 = tpu.matmul %30, %41, %cst_33 {dimension_numbers = #tpu.dot_dimension_numbers<[1], [0], [0], [1], [0, 0, 1, 1], [], []>} : vector<8x128xf32>, vector<128x32xf32>, vector<8x32xf32> -> vector<8x32xf32>
    %43 = tpu.concatenate %36, %36, %36, %36 in 0 : vector<8x32xf32>, vector<8x32xf32>, vector<8x32xf32>, vector<8x32xf32> -> vector<32x32xf32>
    %44 = arith.mulf %43, %3 : vector<32x32xf32>
    %45 = tpu.concatenate %39, %39, %39, %39 in 0 : vector<8x32xf32>, vector<8x32xf32>, vector<8x32xf32>, vector<8x32xf32> -> vector<32x32xf32>
    %46 = arith.mulf %45, %3 : vector<32x32xf32>
    %cst_34 = arith.constant dense<0.000000e+00> : vector<8x32xf32>
    %47 = tpu.matmul %33, %44, %cst_34 {dimension_numbers = #tpu.dot_dimension_numbers<[1], [1], [0], [0], [0, 0, 1, 0], [], []>} : vector<8x32xf32>, vector<32x32xf32>, vector<8x32xf32> -> vector<8x32xf32>
    %cst_35 = arith.constant 0.353553385 : f32
    %48 = vector.broadcast %cst_35 : f32 to vector<8x32xf32>
    %49 = arith.mulf %47, %48 : vector<8x32xf32>
    %cst_36 = arith.constant dense<0xFF800000> : vector<8xf32>
    %50 = vector.multi_reduction <maximumf>, %49, %cst_36 [1] : vector<8x32xf32> to vector<8xf32>
    %51 = vector.shape_cast %50 : vector<8xf32> to vector<8x1xf32>
    %52 = vector.broadcast %51 : vector<8x1xf32> to vector<8x32xf32>
    %53 = arith.subf %49, %52 : vector<8x32xf32>
    %54 = math.exp %53 : vector<8x32xf32>
    %cst_37 = arith.constant dense<0.000000e+00> : vector<8x32xf32>
    %55 = tpu.matmul %54, %4, %cst_37 {dimension_numbers = #tpu.dot_dimension_numbers<[1], [0], [0], [1], [0, 0, 1, 1], [], []>} : vector<8x32xf32>, vector<32x32xf32>, vector<8x32xf32> -> vector<8x32xf32>
    %56 = tpu.reciprocal %55 {approx = true} : vector<8x32xf32> -> vector<8x32xf32>
    %57 = arith.mulf %54, %56 : vector<8x32xf32>
    %cst_38 = arith.constant dense<0.000000e+00> : vector<8x32xf32>
    %58 = tpu.matmul %57, %46, %cst_38 {dimension_numbers = #tpu.dot_dimension_numbers<[1], [0], [0], [1], [0, 0, 1, 1], [], []>} : vector<8x32xf32>, vector<32x32xf32>, vector<8x32xf32> -> vector<8x32xf32>
    %cst_39 = arith.constant dense<0.000000e+00> : vector<8x32xf32>
    %59 = tpu.matmul %2, %42, %cst_39 {dimension_numbers = #tpu.dot_dimension_numbers<[1], [0], [0], [1], [0, 0, 1, 1], [], []>} : vector<8x8xf32>, vector<8x32xf32>, vector<8x32xf32> -> vector<8x32xf32>
    %c0_40 = arith.constant 0 : index
    %c0_41 = arith.constant 0 : index
    %c0_42 = arith.constant 0 : index
    %60 = vector.load %arg11[%c0_40, %c0_41, %c0_42] : memref<2x32x128xf32, #tpu.memory_space<vmem>>, vector<1x32x128xf32>
    %61 = vector.shape_cast %60 : vector<1x32x128xf32> to vector<32x128xf32>
    %cst_43 = arith.constant dense<0.000000e+00> : vector<8x128xf32>
    %62 = tpu.matmul %58, %61, %cst_43 {dimension_numbers = #tpu.dot_dimension_numbers<[1], [0], [0], [1], [0, 0, 1, 1], [], []>} : vector<8x32xf32>, vector<32x128xf32>, vector<8x128xf32> -> vector<8x128xf32>
    %c0_44 = arith.constant 0 : index
    %c0_45 = arith.constant 0 : index
    %c0_46 = arith.constant 0 : index
    %63 = vector.load %arg12[%c0_44, %c0_45, %c0_46] : memref<2x32x128xf32, #tpu.memory_space<vmem>>, vector<1x32x128xf32>
    %64 = vector.shape_cast %63 : vector<1x32x128xf32> to vector<32x128xf32>
    %cst_47 = arith.constant dense<0.000000e+00> : vector<8x128xf32>
    %65 = tpu.matmul %59, %64, %cst_47 {dimension_numbers = #tpu.dot_dimension_numbers<[1], [0], [0], [1], [0, 0, 1, 1], [], []>} : vector<8x32xf32>, vector<32x128xf32>, vector<8x128xf32> -> vector<8x128xf32>
    %66 = arith.addf %62, %65 : vector<8x128xf32>
    %c0_48 = arith.constant 0 : index
    %c0_49 = arith.constant 0 : index
    %c0_50 = arith.constant 0 : index
    %67 = vector.load %arg13[%c0_48, %c0_49, %c0_50] : memref<2x1x128xf32, #tpu.memory_space<vmem>>, vector<1x1x128xf32>
    %68 = vector.shape_cast %67 : vector<1x1x128xf32> to vector<1x128xf32>
    %69 = vector.broadcast %68 : vector<1x128xf32> to vector<8x128xf32>
    %70 = arith.addf %66, %69 : vector<8x128xf32>
    %71 = arith.addf %70, %1 : vector<8x128xf32>
    %c0_51 = arith.constant 0 : index
    %c0_52 = arith.constant 0 : index
    %c0_53 = arith.constant 0 : index
    %72 = vector.load %arg14[%c0_51, %c0_52, %c0_53] : memref<2x1x128xf32, #tpu.memory_space<vmem>>, vector<1x1x128xf32>
    %73 = vector.shape_cast %72 : vector<1x1x128xf32> to vector<1x128xf32>
    %c0_54 = arith.constant 0 : index
    %c0_55 = arith.constant 0 : index
    %c0_56 = arith.constant 0 : index
    %74 = vector.load %arg15[%c0_54, %c0_55, %c0_56] : memref<2x1x128xf32, #tpu.memory_space<vmem>>, vector<1x1x128xf32>
    %75 = vector.shape_cast %74 : vector<1x1x128xf32> to vector<1x128xf32>
    %cst_57 = arith.constant dense<0.000000e+00> : vector<8xf32>
    %76 = vector.multi_reduction <add>, %71, %cst_57 [1] : vector<8x128xf32> to vector<8xf32>
    %77 = vector.shape_cast %76 : vector<8xf32> to vector<8x1xf32>
    %cst_58 = arith.constant 3.125000e-02 : f32
    %78 = vector.broadcast %cst_58 : f32 to vector<8x1xf32>
    %79 = arith.mulf %77, %78 : vector<8x1xf32>
    %80 = arith.mulf %71, %71 : vector<8x128xf32>
    %cst_59 = arith.constant dense<0.000000e+00> : vector<8xf32>
    %81 = vector.multi_reduction <add>, %80, %cst_59 [1] : vector<8x128xf32> to vector<8xf32>
    %82 = vector.shape_cast %81 : vector<8xf32> to vector<8x1xf32>
    %cst_60 = arith.constant 3.125000e-02 : f32
    %83 = vector.broadcast %cst_60 : f32 to vector<8x1xf32>
    %84 = arith.mulf %82, %83 : vector<8x1xf32>
    %85 = arith.mulf %79, %79 : vector<8x1xf32>
    %86 = arith.subf %84, %85 : vector<8x1xf32>
    %87 = vector.broadcast %79 : vector<8x1xf32> to vector<8x128xf32>
    %88 = arith.subf %71, %87 : vector<8x128xf32>
    %cst_61 = arith.constant 9.99999974E-6 : f32
    %89 = vector.broadcast %cst_61 : f32 to vector<8x1xf32>
    %90 = arith.addf %86, %89 : vector<8x1xf32>
    %91 = math.rsqrt %90 : vector<8x1xf32>
    %92 = vector.broadcast %91 : vector<8x1xf32> to vector<8x128xf32>
    %93 = arith.mulf %88, %92 : vector<8x128xf32>
    %94 = vector.broadcast %73 : vector<1x128xf32> to vector<8x128xf32>
    %95 = arith.mulf %93, %94 : vector<8x128xf32>
    %96 = vector.broadcast %75 : vector<1x128xf32> to vector<8x128xf32>
    %97 = arith.addf %95, %96 : vector<8x128xf32>
    %c0_62 = arith.constant 0 : index
    %c0_63 = arith.constant 0 : index
    %c0_64 = arith.constant 0 : index
    %98 = vector.load %arg16[%c0_62, %c0_63, %c0_64] : memref<2x128x128xf32, #tpu.memory_space<vmem>>, vector<1x128x128xf32>
    %99 = vector.shape_cast %98 : vector<1x128x128xf32> to vector<128x128xf32>
    %cst_65 = arith.constant dense<0.000000e+00> : vector<8x128xf32>
    %100 = tpu.matmul %97, %99, %cst_65 {dimension_numbers = #tpu.dot_dimension_numbers<[1], [0], [0], [1], [0, 0, 1, 1], [], []>} : vector<8x128xf32>, vector<128x128xf32>, vector<8x128xf32> -> vector<8x128xf32>
    %c0_66 = arith.constant 0 : index
    %c0_67 = arith.constant 0 : index
    %c0_68 = arith.constant 0 : index
    %101 = vector.load %arg17[%c0_66, %c0_67, %c0_68] : memref<2x1x128xf32, #tpu.memory_space<vmem>>, vector<1x1x128xf32>
    %102 = vector.shape_cast %101 : vector<1x1x128xf32> to vector<1x128xf32>
    %103 = vector.broadcast %102 : vector<1x128xf32> to vector<8x128xf32>
    %104 = arith.addf %100, %103 : vector<8x128xf32>
    %cst_69 = arith.constant 5.000000e-01 : f32
    %105 = vector.broadcast %cst_69 : f32 to vector<8x128xf32>
    %106 = arith.mulf %105, %104 : vector<8x128xf32>
    %cst_70 = arith.constant 4.471500e-02 : f32
    %107 = vector.broadcast %cst_70 : f32 to vector<8x128xf32>
    %108 = arith.mulf %107, %104 : vector<8x128xf32>
    %109 = arith.mulf %108, %104 : vector<8x128xf32>
    %110 = arith.mulf %109, %104 : vector<8x128xf32>
    %111 = arith.addf %104, %110 : vector<8x128xf32>
    %cst_71 = arith.constant 0.797884583 : f32
    %112 = vector.broadcast %cst_71 : f32 to vector<8x128xf32>
    %113 = arith.mulf %112, %111 : vector<8x128xf32>
    %114 = math.tanh %113 : vector<8x128xf32>
    %cst_72 = arith.constant 1.000000e+00 : f32
    %115 = vector.broadcast %cst_72 : f32 to vector<8x128xf32>
    %116 = arith.addf %115, %114 : vector<8x128xf32>
    %117 = arith.mulf %106, %116 : vector<8x128xf32>
    %c0_73 = arith.constant 0 : index
    %c0_74 = arith.constant 0 : index
    %c0_75 = arith.constant 0 : index
    %118 = vector.load %arg18[%c0_73, %c0_74, %c0_75] : memref<2x128x128xf32, #tpu.memory_space<vmem>>, vector<1x128x128xf32>
    %119 = vector.shape_cast %118 : vector<1x128x128xf32> to vector<128x128xf32>
    %cst_76 = arith.constant dense<0.000000e+00> : vector<8x128xf32>
    %120 = tpu.matmul %117, %119, %cst_76 {dimension_numbers = #tpu.dot_dimension_numbers<[1], [0], [0], [1], [0, 0, 1, 1], [], []>} : vector<8x128xf32>, vector<128x128xf32>, vector<8x128xf32> -> vector<8x128xf32>
    %c0_77 = arith.constant 0 : index
    %c0_78 = arith.constant 0 : index
    %c0_79 = arith.constant 0 : index
    %121 = vector.load %arg19[%c0_77, %c0_78, %c0_79] : memref<2x1x128xf32, #tpu.memory_space<vmem>>, vector<1x1x128xf32>
    %122 = vector.shape_cast %121 : vector<1x1x128xf32> to vector<1x128xf32>
    %123 = vector.broadcast %122 : vector<1x128xf32> to vector<8x128xf32>
    %124 = arith.addf %120, %123 : vector<8x128xf32>
    %125 = arith.addf %124, %71 : vector<8x128xf32>
    %c1 = arith.constant 1 : index
    %c0_80 = arith.constant 0 : index
    %c0_81 = arith.constant 0 : index
    %126 = vector.load %arg5[%c1, %c0_80, %c0_81] : memref<2x1x128xf32, #tpu.memory_space<vmem>>, vector<1x1x128xf32>
    %127 = vector.shape_cast %126 : vector<1x1x128xf32> to vector<1x128xf32>
    %c1_82 = arith.constant 1 : index
    %c0_83 = arith.constant 0 : index
    %c0_84 = arith.constant 0 : index
    %128 = vector.load %arg6[%c1_82, %c0_83, %c0_84] : memref<2x1x128xf32, #tpu.memory_space<vmem>>, vector<1x1x128xf32>
    %129 = vector.shape_cast %128 : vector<1x1x128xf32> to vector<1x128xf32>
    %cst_85 = arith.constant dense<0.000000e+00> : vector<8xf32>
    %130 = vector.multi_reduction <add>, %125, %cst_85 [1] : vector<8x128xf32> to vector<8xf32>
    %131 = vector.shape_cast %130 : vector<8xf32> to vector<8x1xf32>
    %cst_86 = arith.constant 3.125000e-02 : f32
    %132 = vector.broadcast %cst_86 : f32 to vector<8x1xf32>
    %133 = arith.mulf %131, %132 : vector<8x1xf32>
    %134 = arith.mulf %125, %125 : vector<8x128xf32>
    %cst_87 = arith.constant dense<0.000000e+00> : vector<8xf32>
    %135 = vector.multi_reduction <add>, %134, %cst_87 [1] : vector<8x128xf32> to vector<8xf32>
    %136 = vector.shape_cast %135 : vector<8xf32> to vector<8x1xf32>
    %cst_88 = arith.constant 3.125000e-02 : f32
    %137 = vector.broadcast %cst_88 : f32 to vector<8x1xf32>
    %138 = arith.mulf %136, %137 : vector<8x1xf32>
    %139 = arith.mulf %133, %133 : vector<8x1xf32>
    %140 = arith.subf %138, %139 : vector<8x1xf32>
    %141 = vector.broadcast %133 : vector<8x1xf32> to vector<8x128xf32>
    %142 = arith.subf %125, %141 : vector<8x128xf32>
    %cst_89 = arith.constant 9.99999974E-6 : f32
    %143 = vector.broadcast %cst_89 : f32 to vector<8x1xf32>
    %144 = arith.addf %140, %143 : vector<8x1xf32>
    %145 = math.rsqrt %144 : vector<8x1xf32>
    %146 = vector.broadcast %145 : vector<8x1xf32> to vector<8x128xf32>
    %147 = arith.mulf %142, %146 : vector<8x128xf32>
    %148 = vector.broadcast %127 : vector<1x128xf32> to vector<8x128xf32>
    %149 = arith.mulf %147, %148 : vector<8x128xf32>
    %150 = vector.broadcast %129 : vector<1x128xf32> to vector<8x128xf32>
    %151 = arith.addf %149, %150 : vector<8x128xf32>
    %c1_90 = arith.constant 1 : index
    %c0_91 = arith.constant 0 : index
    %c0_92 = arith.constant 0 : index
    %152 = vector.load %arg7[%c1_90, %c0_91, %c0_92] : memref<2x128x32xf32, #tpu.memory_space<vmem>>, vector<1x128x32xf32>
    %153 = vector.shape_cast %152 : vector<1x128x32xf32> to vector<128x32xf32>
    %cst_93 = arith.constant dense<0.000000e+00> : vector<8x32xf32>
    %154 = tpu.matmul %151, %153, %cst_93 {dimension_numbers = #tpu.dot_dimension_numbers<[1], [0], [0], [1], [0, 0, 1, 1], [], []>} : vector<8x128xf32>, vector<128x32xf32>, vector<8x32xf32> -> vector<8x32xf32>
    %c1_94 = arith.constant 1 : index
    %c0_95 = arith.constant 0 : index
    %c0_96 = arith.constant 0 : index
    %155 = vector.load %arg8[%c1_94, %c0_95, %c0_96] : memref<2x128x32xf32, #tpu.memory_space<vmem>>, vector<1x128x32xf32>
    %156 = vector.shape_cast %155 : vector<1x128x32xf32> to vector<128x32xf32>
    %cst_97 = arith.constant dense<0.000000e+00> : vector<8x32xf32>
    %157 = tpu.matmul %151, %156, %cst_97 {dimension_numbers = #tpu.dot_dimension_numbers<[1], [0], [0], [1], [0, 0, 1, 1], [], []>} : vector<8x128xf32>, vector<128x32xf32>, vector<8x32xf32> -> vector<8x32xf32>
    %c1_98 = arith.constant 1 : index
    %c0_99 = arith.constant 0 : index
    %c0_100 = arith.constant 0 : index
    %158 = vector.load %arg9[%c1_98, %c0_99, %c0_100] : memref<2x128x32xf32, #tpu.memory_space<vmem>>, vector<1x128x32xf32>
    %159 = vector.shape_cast %158 : vector<1x128x32xf32> to vector<128x32xf32>
    %cst_101 = arith.constant dense<0.000000e+00> : vector<8x32xf32>
    %160 = tpu.matmul %151, %159, %cst_101 {dimension_numbers = #tpu.dot_dimension_numbers<[1], [0], [0], [1], [0, 0, 1, 1], [], []>} : vector<8x128xf32>, vector<128x32xf32>, vector<8x32xf32> -> vector<8x32xf32>
    %c1_102 = arith.constant 1 : index
    %c0_103 = arith.constant 0 : index
    %c0_104 = arith.constant 0 : index
    %161 = vector.load %arg10[%c1_102, %c0_103, %c0_104] : memref<2x128x32xf32, #tpu.memory_space<vmem>>, vector<1x128x32xf32>
    %162 = vector.shape_cast %161 : vector<1x128x32xf32> to vector<128x32xf32>
    %cst_105 = arith.constant dense<0.000000e+00> : vector<8x32xf32>
    %163 = tpu.matmul %151, %162, %cst_105 {dimension_numbers = #tpu.dot_dimension_numbers<[1], [0], [0], [1], [0, 0, 1, 1], [], []>} : vector<8x128xf32>, vector<128x32xf32>, vector<8x32xf32> -> vector<8x32xf32>
    %164 = tpu.concatenate %157, %157, %157, %157 in 0 : vector<8x32xf32>, vector<8x32xf32>, vector<8x32xf32>, vector<8x32xf32> -> vector<32x32xf32>
    %165 = arith.mulf %164, %3 : vector<32x32xf32>
    %166 = tpu.concatenate %160, %160, %160, %160 in 0 : vector<8x32xf32>, vector<8x32xf32>, vector<8x32xf32>, vector<8x32xf32> -> vector<32x32xf32>
    %167 = arith.mulf %166, %3 : vector<32x32xf32>
    %cst_106 = arith.constant dense<0.000000e+00> : vector<8x32xf32>
    %168 = tpu.matmul %154, %165, %cst_106 {dimension_numbers = #tpu.dot_dimension_numbers<[1], [1], [0], [0], [0, 0, 1, 0], [], []>} : vector<8x32xf32>, vector<32x32xf32>, vector<8x32xf32> -> vector<8x32xf32>
    %cst_107 = arith.constant 0.353553385 : f32
    %169 = vector.broadcast %cst_107 : f32 to vector<8x32xf32>
    %170 = arith.mulf %168, %169 : vector<8x32xf32>
    %cst_108 = arith.constant dense<0xFF800000> : vector<8xf32>
    %171 = vector.multi_reduction <maximumf>, %170, %cst_108 [1] : vector<8x32xf32> to vector<8xf32>
    %172 = vector.shape_cast %171 : vector<8xf32> to vector<8x1xf32>
    %173 = vector.broadcast %172 : vector<8x1xf32> to vector<8x32xf32>
    %174 = arith.subf %170, %173 : vector<8x32xf32>
    %175 = math.exp %174 : vector<8x32xf32>
    %cst_109 = arith.constant dense<0.000000e+00> : vector<8x32xf32>
    %176 = tpu.matmul %175, %4, %cst_109 {dimension_numbers = #tpu.dot_dimension_numbers<[1], [0], [0], [1], [0, 0, 1, 1], [], []>} : vector<8x32xf32>, vector<32x32xf32>, vector<8x32xf32> -> vector<8x32xf32>
    %177 = tpu.reciprocal %176 {approx = true} : vector<8x32xf32> -> vector<8x32xf32>
    %178 = arith.mulf %175, %177 : vector<8x32xf32>
    %cst_110 = arith.constant dense<0.000000e+00> : vector<8x32xf32>
    %179 = tpu.matmul %178, %167, %cst_110 {dimension_numbers = #tpu.dot_dimension_numbers<[1], [0], [0], [1], [0, 0, 1, 1], [], []>} : vector<8x32xf32>, vector<32x32xf32>, vector<8x32xf32> -> vector<8x32xf32>
    %cst_111 = arith.constant dense<0.000000e+00> : vector<8x32xf32>
    %180 = tpu.matmul %2, %163, %cst_111 {dimension_numbers = #tpu.dot_dimension_numbers<[1], [0], [0], [1], [0, 0, 1, 1], [], []>} : vector<8x8xf32>, vector<8x32xf32>, vector<8x32xf32> -> vector<8x32xf32>
    %c1_112 = arith.constant 1 : index
    %c0_113 = arith.constant 0 : index
    %c0_114 = arith.constant 0 : index
    %181 = vector.load %arg11[%c1_112, %c0_113, %c0_114] : memref<2x32x128xf32, #tpu.memory_space<vmem>>, vector<1x32x128xf32>
    %182 = vector.shape_cast %181 : vector<1x32x128xf32> to vector<32x128xf32>
    %cst_115 = arith.constant dense<0.000000e+00> : vector<8x128xf32>
    %183 = tpu.matmul %179, %182, %cst_115 {dimension_numbers = #tpu.dot_dimension_numbers<[1], [0], [0], [1], [0, 0, 1, 1], [], []>} : vector<8x32xf32>, vector<32x128xf32>, vector<8x128xf32> -> vector<8x128xf32>
    %c1_116 = arith.constant 1 : index
    %c0_117 = arith.constant 0 : index
    %c0_118 = arith.constant 0 : index
    %184 = vector.load %arg12[%c1_116, %c0_117, %c0_118] : memref<2x32x128xf32, #tpu.memory_space<vmem>>, vector<1x32x128xf32>
    %185 = vector.shape_cast %184 : vector<1x32x128xf32> to vector<32x128xf32>
    %cst_119 = arith.constant dense<0.000000e+00> : vector<8x128xf32>
    %186 = tpu.matmul %180, %185, %cst_119 {dimension_numbers = #tpu.dot_dimension_numbers<[1], [0], [0], [1], [0, 0, 1, 1], [], []>} : vector<8x32xf32>, vector<32x128xf32>, vector<8x128xf32> -> vector<8x128xf32>
    %187 = arith.addf %183, %186 : vector<8x128xf32>
    %c1_120 = arith.constant 1 : index
    %c0_121 = arith.constant 0 : index
    %c0_122 = arith.constant 0 : index
    %188 = vector.load %arg13[%c1_120, %c0_121, %c0_122] : memref<2x1x128xf32, #tpu.memory_space<vmem>>, vector<1x1x128xf32>
    %189 = vector.shape_cast %188 : vector<1x1x128xf32> to vector<1x128xf32>
    %190 = vector.broadcast %189 : vector<1x128xf32> to vector<8x128xf32>
    %191 = arith.addf %187, %190 : vector<8x128xf32>
    %192 = arith.addf %191, %125 : vector<8x128xf32>
    %c1_123 = arith.constant 1 : index
    %c0_124 = arith.constant 0 : index
    %c0_125 = arith.constant 0 : index
    %193 = vector.load %arg14[%c1_123, %c0_124, %c0_125] : memref<2x1x128xf32, #tpu.memory_space<vmem>>, vector<1x1x128xf32>
    %194 = vector.shape_cast %193 : vector<1x1x128xf32> to vector<1x128xf32>
    %c1_126 = arith.constant 1 : index
    %c0_127 = arith.constant 0 : index
    %c0_128 = arith.constant 0 : index
    %195 = vector.load %arg15[%c1_126, %c0_127, %c0_128] : memref<2x1x128xf32, #tpu.memory_space<vmem>>, vector<1x1x128xf32>
    %196 = vector.shape_cast %195 : vector<1x1x128xf32> to vector<1x128xf32>
    %cst_129 = arith.constant dense<0.000000e+00> : vector<8xf32>
    %197 = vector.multi_reduction <add>, %192, %cst_129 [1] : vector<8x128xf32> to vector<8xf32>
    %198 = vector.shape_cast %197 : vector<8xf32> to vector<8x1xf32>
    %cst_130 = arith.constant 3.125000e-02 : f32
    %199 = vector.broadcast %cst_130 : f32 to vector<8x1xf32>
    %200 = arith.mulf %198, %199 : vector<8x1xf32>
    %201 = arith.mulf %192, %192 : vector<8x128xf32>
    %cst_131 = arith.constant dense<0.000000e+00> : vector<8xf32>
    %202 = vector.multi_reduction <add>, %201, %cst_131 [1] : vector<8x128xf32> to vector<8xf32>
    %203 = vector.shape_cast %202 : vector<8xf32> to vector<8x1xf32>
    %cst_132 = arith.constant 3.125000e-02 : f32
    %204 = vector.broadcast %cst_132 : f32 to vector<8x1xf32>
    %205 = arith.mulf %203, %204 : vector<8x1xf32>
    %206 = arith.mulf %200, %200 : vector<8x1xf32>
    %207 = arith.subf %205, %206 : vector<8x1xf32>
    %208 = vector.broadcast %200 : vector<8x1xf32> to vector<8x128xf32>
    %209 = arith.subf %192, %208 : vector<8x128xf32>
    %cst_133 = arith.constant 9.99999974E-6 : f32
    %210 = vector.broadcast %cst_133 : f32 to vector<8x1xf32>
    %211 = arith.addf %207, %210 : vector<8x1xf32>
    %212 = math.rsqrt %211 : vector<8x1xf32>
    %213 = vector.broadcast %212 : vector<8x1xf32> to vector<8x128xf32>
    %214 = arith.mulf %209, %213 : vector<8x128xf32>
    %215 = vector.broadcast %194 : vector<1x128xf32> to vector<8x128xf32>
    %216 = arith.mulf %214, %215 : vector<8x128xf32>
    %217 = vector.broadcast %196 : vector<1x128xf32> to vector<8x128xf32>
    %218 = arith.addf %216, %217 : vector<8x128xf32>
    %c1_134 = arith.constant 1 : index
    %c0_135 = arith.constant 0 : index
    %c0_136 = arith.constant 0 : index
    %219 = vector.load %arg16[%c1_134, %c0_135, %c0_136] : memref<2x128x128xf32, #tpu.memory_space<vmem>>, vector<1x128x128xf32>
    %220 = vector.shape_cast %219 : vector<1x128x128xf32> to vector<128x128xf32>
    %cst_137 = arith.constant dense<0.000000e+00> : vector<8x128xf32>
    %221 = tpu.matmul %218, %220, %cst_137 {dimension_numbers = #tpu.dot_dimension_numbers<[1], [0], [0], [1], [0, 0, 1, 1], [], []>} : vector<8x128xf32>, vector<128x128xf32>, vector<8x128xf32> -> vector<8x128xf32>
    %c1_138 = arith.constant 1 : index
    %c0_139 = arith.constant 0 : index
    %c0_140 = arith.constant 0 : index
    %222 = vector.load %arg17[%c1_138, %c0_139, %c0_140] : memref<2x1x128xf32, #tpu.memory_space<vmem>>, vector<1x1x128xf32>
    %223 = vector.shape_cast %222 : vector<1x1x128xf32> to vector<1x128xf32>
    %224 = vector.broadcast %223 : vector<1x128xf32> to vector<8x128xf32>
    %225 = arith.addf %221, %224 : vector<8x128xf32>
    %cst_141 = arith.constant 5.000000e-01 : f32
    %226 = vector.broadcast %cst_141 : f32 to vector<8x128xf32>
    %227 = arith.mulf %226, %225 : vector<8x128xf32>
    %cst_142 = arith.constant 4.471500e-02 : f32
    %228 = vector.broadcast %cst_142 : f32 to vector<8x128xf32>
    %229 = arith.mulf %228, %225 : vector<8x128xf32>
    %230 = arith.mulf %229, %225 : vector<8x128xf32>
    %231 = arith.mulf %230, %225 : vector<8x128xf32>
    %232 = arith.addf %225, %231 : vector<8x128xf32>
    %cst_143 = arith.constant 0.797884583 : f32
    %233 = vector.broadcast %cst_143 : f32 to vector<8x128xf32>
    %234 = arith.mulf %233, %232 : vector<8x128xf32>
    %235 = math.tanh %234 : vector<8x128xf32>
    %cst_144 = arith.constant 1.000000e+00 : f32
    %236 = vector.broadcast %cst_144 : f32 to vector<8x128xf32>
    %237 = arith.addf %236, %235 : vector<8x128xf32>
    %238 = arith.mulf %227, %237 : vector<8x128xf32>
    %c1_145 = arith.constant 1 : index
    %c0_146 = arith.constant 0 : index
    %c0_147 = arith.constant 0 : index
    %239 = vector.load %arg18[%c1_145, %c0_146, %c0_147] : memref<2x128x128xf32, #tpu.memory_space<vmem>>, vector<1x128x128xf32>
    %240 = vector.shape_cast %239 : vector<1x128x128xf32> to vector<128x128xf32>
    %cst_148 = arith.constant dense<0.000000e+00> : vector<8x128xf32>
    %241 = tpu.matmul %238, %240, %cst_148 {dimension_numbers = #tpu.dot_dimension_numbers<[1], [0], [0], [1], [0, 0, 1, 1], [], []>} : vector<8x128xf32>, vector<128x128xf32>, vector<8x128xf32> -> vector<8x128xf32>
    %c1_149 = arith.constant 1 : index
    %c0_150 = arith.constant 0 : index
    %c0_151 = arith.constant 0 : index
    %242 = vector.load %arg19[%c1_149, %c0_150, %c0_151] : memref<2x1x128xf32, #tpu.memory_space<vmem>>, vector<1x1x128xf32>
    %243 = vector.shape_cast %242 : vector<1x1x128xf32> to vector<1x128xf32>
    %244 = vector.broadcast %243 : vector<1x128xf32> to vector<8x128xf32>
    %245 = arith.addf %241, %244 : vector<8x128xf32>
    %246 = arith.addf %245, %192 : vector<8x128xf32>
    %c0_152 = arith.constant 0 : index
    %c0_153 = arith.constant 0 : index
    %c0_154 = arith.constant 0 : index
    %247 = vector.load %arg20[%c0_152, %c0_153, %c0_154] : memref<1x8x128xf32, #tpu.memory_space<vmem>>, vector<1x8x128xf32>
    %248 = vector.shape_cast %247 : vector<1x8x128xf32> to vector<8x128xf32>
    %249 = vector.shape_cast %246 : vector<8x128xf32> to vector<1x8x128xf32>
    tpu.vector_store %arg20[%c0_152, %c0_153, %c0_154], %249 {strides = array<i32>} : memref<1x8x128xf32, #tpu.memory_space<vmem>>, vector<1x8x128xf32>,
    return
  }
  func.func @transform_0(%arg0: i32) -> (i32, i32, i32) {
    %c0_i32 = arith.constant 0 : i32
    %c0_i32_0 = arith.constant 0 : i32
    %c0_i32_1 = arith.constant 0 : i32
    return %arg0, %c0_i32, %c0_i32_0 : i32, i32, i32
  }
  func.func @transform_1(%arg0: i32) -> (i32, i32) {
    %c0_i32 = arith.constant 0 : i32
    %c0_i32_0 = arith.constant 0 : i32
    %c0_i32_1 = arith.constant 0 : i32
    return %c0_i32, %c0_i32_0 : i32, i32
  }
  func.func @transform_2(%arg0: i32) -> (i32, i32) {
    %c0_i32 = arith.constant 0 : i32
    %c0_i32_0 = arith.constant 0 : i32
    %c0_i32_1 = arith.constant 0 : i32
    return %c0_i32, %c0_i32_0 : i32, i32
  }
  func.func @transform_3(%arg0: i32) -> (i32, i32) {
    %c0_i32 = arith.constant 0 : i32
    %c0_i32_0 = arith.constant 0 : i32
    %c0_i32_1 = arith.constant 0 : i32
    return %c0_i32, %c0_i32_0 : i32, i32
  }
  func.func @transform_4(%arg0: i32) -> (i32, i32, i32) {
    %c0_i32 = arith.constant 0 : i32
    %c0_i32_0 = arith.constant 0 : i32
    %c0_i32_1 = arith.constant 0 : i32
    %c0_i32_2 = arith.constant 0 : i32
    return %c0_i32, %c0_i32_0, %c0_i32_1 : i32, i32, i32
  }
  func.func @transform_5(%arg0: i32) -> (i32, i32, i32) {
    %c0_i32 = arith.constant 0 : i32
    %c0_i32_0 = arith.constant 0 : i32
    %c0_i32_1 = arith.constant 0 : i32
    %c0_i32_2 = arith.constant 0 : i32
    return %c0_i32, %c0_i32_0, %c0_i32_1 : i32, i32, i32
  }
  func.func @transform_6(%arg0: i32) -> (i32, i32, i32) {
    %c0_i32 = arith.constant 0 : i32
    %c0_i32_0 = arith.constant 0 : i32
    %c0_i32_1 = arith.constant 0 : i32
    %c0_i32_2 = arith.constant 0 : i32
    return %c0_i32, %c0_i32_0, %c0_i32_1 : i32, i32, i32
  }
  func.func @transform_7(%arg0: i32) -> (i32, i32, i32) {
    %c0_i32 = arith.constant 0 : i32
    %c0_i32_0 = arith.constant 0 : i32
    %c0_i32_1 = arith.constant 0 : i32
    %c0_i32_2 = arith.constant 0 : i32
    return %c0_i32, %c0_i32_0, %c0_i32_1 : i32, i32, i32
  }
  func.func @transform_8(%arg0: i32) -> (i32, i32, i32) {
    %c0_i32 = arith.constant 0 : i32
    %c0_i32_0 = arith.constant 0 : i32
    %c0_i32_1 = arith.constant 0 : i32
    %c0_i32_2 = arith.constant 0 : i32
    return %c0_i32, %c0_i32_0, %c0_i32_1 : i32, i32, i32
  }
  func.func @transform_9(%arg0: i32) -> (i32, i32, i32) {
    %c0_i32 = arith.constant 0 : i32
    %c0_i32_0 = arith.constant 0 : i32
    %c0_i32_1 = arith.constant 0 : i32
    %c0_i32_2 = arith.constant 0 : i32
    return %c0_i32, %c0_i32_0, %c0_i32_1 : i32, i32, i32
  }
  func.func @transform_10(%arg0: i32) -> (i32, i32, i32) {
    %c0_i32 = arith.constant 0 : i32
    %c0_i32_0 = arith.constant 0 : i32
    %c0_i32_1 = arith.constant 0 : i32
    %c0_i32_2 = arith.constant 0 : i32
    return %c0_i32, %c0_i32_0, %c0_i32_1 : i32, i32, i32
  }
  func.func @transform_11(%arg0: i32) -> (i32, i32, i32) {
    %c0_i32 = arith.constant 0 : i32
    %c0_i32_0 = arith.constant 0 : i32
    %c0_i32_1 = arith.constant 0 : i32
    %c0_i32_2 = arith.constant 0 : i32
    return %c0_i32, %c0_i32_0, %c0_i32_1 : i32, i32, i32
  }
  func.func @transform_12(%arg0: i32) -> (i32, i32, i32) {
    %c0_i32 = arith.constant 0 : i32
    %c0_i32_0 = arith.constant 0 : i32
    %c0_i32_1 = arith.constant 0 : i32
    %c0_i32_2 = arith.constant 0 : i32
    return %c0_i32, %c0_i32_0, %c0_i32_1 : i32, i32, i32
  }
  func.func @transform_13(%arg0: i32) -> (i32, i32, i32) {
    %c0_i32 = arith.constant 0 : i32
    %c0_i32_0 = arith.constant 0 : i32
    %c0_i32_1 = arith.constant 0 : i32
    %c0_i32_2 = arith.constant 0 : i32
    return %c0_i32, %c0_i32_0, %c0_i32_1 : i32, i32, i32
  }
  func.func @transform_14(%arg0: i32) -> (i32, i32, i32) {
    %c0_i32 = arith.constant 0 : i32
    %c0_i32_0 = arith.constant 0 : i32
    %c0_i32_1 = arith.constant 0 : i32
    %c0_i32_2 = arith.constant 0 : i32
    return %c0_i32, %c0_i32_0, %c0_i32_1 : i32, i32, i32
  }
  func.func @transform_15(%arg0: i32) -> (i32, i32, i32) {
    %c0_i32 = arith.constant 0 : i32
    %c0_i32_0 = arith.constant 0 : i32
    %c0_i32_1 = arith.constant 0 : i32
    %c0_i32_2 = arith.constant 0 : i32
    return %c0_i32, %c0_i32_0, %c0_i32_1 : i32, i32, i32
  }
  func.func @transform_16(%arg0: i32) -> (i32, i32, i32) {
    %c0_i32 = arith.constant 0 : i32
    %c0_i32_0 = arith.constant 0 : i32
    %c0_i32_1 = arith.constant 0 : i32
    %c0_i32_2 = arith.constant 0 : i32
    return %c0_i32, %c0_i32_0, %c0_i32_1 : i32, i32, i32
  }
  func.func @transform_17(%arg0: i32) -> (i32, i32, i32) {
    %c0_i32 = arith.constant 0 : i32
    %c0_i32_0 = arith.constant 0 : i32
    %c0_i32_1 = arith.constant 0 : i32
    %c0_i32_2 = arith.constant 0 : i32
    return %c0_i32, %c0_i32_0, %c0_i32_1 : i32, i32, i32
  }
  func.func @transform_18(%arg0: i32) -> (i32, i32, i32) {
    %c0_i32 = arith.constant 0 : i32
    %c0_i32_0 = arith.constant 0 : i32
    %c0_i32_1 = arith.constant 0 : i32
    %c0_i32_2 = arith.constant 0 : i32
    return %c0_i32, %c0_i32_0, %c0_i32_1 : i32, i32, i32
  }
  func.func @transform_19(%arg0: i32) -> (i32, i32, i32) {
    %c0_i32 = arith.constant 0 : i32
    %c0_i32_0 = arith.constant 0 : i32
    %c0_i32_1 = arith.constant 0 : i32
    return %arg0, %c0_i32, %c0_i32_0 : i32, i32, i32
  }
}

</mosaic_0001>

<bundles_post_ra>
// kernel: tpu_custom_call.1
= control target key start
LH: loop header
LB: loop body
LE: loop exit
PB: predicated region body
PF: predicated region fallthrough
CT: control target
= control target key end

     0   :  { %s5458_s0 = inlined_call_operand.vmem [shape: f32[2,8,128], index: 0, kind: input, shape index: {}]   ;;  %s5459_s1 = inlined_call_operand.vmem [shape: f32[8,8], index: 1, kind: input, shape index: {}]   ;;  %s5460_s2 = inlined_call_operand.vmem [shape: f32[32,32], index: 2, kind: input, shape index: {}]   ;;  %s5461_s3 = inlined_call_operand.vmem [shape: f32[32,32], index: 3, kind: input, shape index: {}]   ;;  %s5462_s4 = inlined_call_operand.vmem [shape: f32[2,1,128], index: 4, kind: input, shape index: {}]   ;;  %s5463_s5 = inlined_call_operand.vmem [shape: f32[2,1,128], index: 5, kind: input, shape index: {}]   ;;  %s5464_s6 = inlined_call_operand.vmem [shape: f32[2,128,32], index: 6, kind: input, shape index: {}]   ;;  %s5465_s7 = inlined_call_operand.vmem [shape: f32[2,128,32], index: 7, kind: input, shape index: {}]   ;;  %s5466_s8 = inlined_call_operand.vmem [shape: f32[2,128,32], index: 8, kind: input, shape index: {}]   ;;  %s5467_s9 = inlined_call_operand.vmem [shape: f32[2,128,32], index: 9, kind: input, shape index: {}]   ;;  %s5468_s10 = inlined_call_operand.vmem [shape: f32[2,32,128], index: 10, kind: input, shape index: {}]   ;;  %s5469_s11 = inlined_call_operand.vmem [shape: f32[2,32,128], index: 11, kind: input, shape index: {}]   ;;  %s5470_s12 = inlined_call_operand.vmem [shape: f32[2,1,128], index: 12, kind: input, shape index: {}]   ;;  %s5471_s13 = inlined_call_operand.vmem [shape: f32[2,1,128], index: 13, kind: input, shape index: {}]   ;;  %s5472_s14 = inlined_call_operand.vmem [shape: f32[2,1,128], index: 14, kind: input, shape index: {}]   ;;  %s5473_s15 = inlined_call_operand.vmem [shape: f32[2,128,128], index: 15, kind: input, shape index: {}]   ;;  %s5474_s16 = inlined_call_operand.vmem [shape: f32[2,1,128], index: 16, kind: input, shape index: {}]   ;;  %s5475_s17 = inlined_call_operand.vmem [shape: f32[2,128,128], index: 17, kind: input, shape index: {}]   ;;  %s5476_s18 = inlined_call_operand.vmem [shape: f32[2,1,128], index: 18, kind: input, shape index: {}]   ;;  %s5477_s19 = inlined_call_operand.hbm [shape: f32[2,8,128], index: 19, kind: output, shape index: {}]  }
   0x1   :  { %5487 = sst [smem:[#allocation10_spill]] %s5458_s0 }
   0x2   :  { %5488 = sst [smem:[#allocation11_spill]] %s5459_s1 }
   0x3   :  { %5489 = sst [smem:[#allocation12_spill]] %s5460_s2 }
   0x4   :  { %5490 = sst [smem:[#allocation13_spill]] %s5461_s3 }
   0x5   :  { %24 = vsyncpa [#allocation3], 0 }
   0x6   :  { %26 = vsyncpa [#allocation3 + $0x1], 0  ;;  %s4395_s0 = smov 0   ;;  %s4397_s30 = smov 0  }
   0x7   :  { %s4399_s20 = smov 0   ;;  %s4401_s21 = smov 0  }
   0x8 LB: > { %5491 = sst [smem:[#allocation5_spill]] %s4277_s0  ;;  %s4416_s1 = sadd.s32 4294967295, %s4289_s21   ;;  %s4289_s21 = sphi %s4401_s21, %s5507_s21   ;;  %s4285_s20 = sphi %s4399_s20, %s5509_s20   ;;  %s4281_s30 = sphi %s4397_s30, %s5511_s30   ;;  %s4277_s0 = sphi %s4395_s0, %s5510_s0  }
   0x9   : > { %5492 = sst [smem:[#allocation6_spill]] %s4285_s20  ;;  %s2860_s22 = sadd.s32 4294967294, %s4289_s21  }
   0xa   : > { %s4420_s2 = sadd.s32 1, %s4289_s21   ;;  %s443_s23 = sadd.s32 1, %s4285_s20 }
   0xb   : > { %5493 = sst [smem:[#allocation7_spill]] %s4420_s2  ;;  %s440_s24 = ssub.s32 %s4289_s21, %s4420_s2 }
   0xc   : > { %p453_p0 = scmp.ne.s32.totalorder %s4285_s20, %s4281_s30  ;;  %p441_p1 = scmp.eq.s32.totalorder %s440_s24, 0 }
   0xd   : > { %p454_p2 = scmp.eq.s32.totalorder %s4416_s1, 1  ;;  %p459_p3 = scmp.ne.s32.totalorder %s4281_s30, %s4277_s0 }
   0xe   : > { %p460_p4 = scmp.eq.s32.totalorder %s2860_s22, 1  ;;  %p2863_p7 = scmp.ge.s32.totalorder %s4289_s21, 1 }
   0xf   : > { %s4431_s25 = scalar_select %p441_p1, %s4285_s20, %s443_s23  }
  0x10   : > { %p4433_p5 = por %p454_p2, %p453_p0  ;;  %p4437_p6 = por %p460_p4, %p459_p3 }
  0x11   : > { %5494 = sst [smem:[#allocation8_spill]] %s4431_s25  ;;  %p539_p8 = scmp.lt.s32.totalorder %s4289_s21, 3 }
  0x12   : > { %s5496_s26 = scalar_select %p4437_p6, 1, 0 }
  0x13   : > { %p540_p9 = pnand %p2863_p7, %p539_p8 }
  0x14   : > { %5497 = sst [smem:[#allocation9_spill]] %s5496_s26  ;;  %p594_p10 = scmp.lt.s32.totalorder (!%p540_p9), %s4416_s1, 1  ;;  %v637_v0 = vld [vmem:[%s5464_s6] sm:$0xff] (!%p540_p9)  ;;  %v638_v1 = vld [vmem:[%s5464_s6 + $0x8] sm:$0xff] (!%p540_p9)  ;;  %v4291_v3 = vmov (!%p540_p9), 0.0|0.0   ;;  %v639_v6 = vld [vmem:[%s5464_s6 + $0x10] sm:$0xff] (!%p540_p9) }
  0x15   : > { %543 = sbr.rel (%p540_p9) target bundleno = 4143 (0x102f), region = 96  ;;  %v723_v2 = vld [vmem:[%s5465_s7] sm:$0xff] (!%p540_p9)  ;;  %3813 = vmatprep.subr.bf16.mxu0 (!%p540_p9), %v4291_v3  ;;  %3837 = vmatprep.subr.bf16.mxu1 (!%p540_p9), %v4291_v3  ;;  %v3814_v4 = vpack.c.bf16 (!%p540_p9), %v638_v1, %v637_v0  ;;  %v724_v5 = vld [vmem:[%s5465_s7 + $0x8] sm:$0xff] (!%p540_p9)  ;;  %v640_v7 = vld [vmem:[%s5464_s6 + $0x18] sm:$0xff] (!%p540_p9)  ;;  %s5498_s28 = sld [smem:[#allocation10_spill]] (!%p540_p9)  ;;  %vm4292_vm0 = vmmov (!%p540_p9), 0  }
  0x16   : > { %v3838_v8 = vpack.c.bf16 (!%p540_p9), %v724_v5, %v723_v2  ;;  %v725_v9 = vld [vmem:[%s5465_s7 + $0x10] sm:$0xff] (!%p540_p9)  ;;  %v726_v10 = vld [vmem:[%s5465_s7 + $0x18] sm:$0xff] (!%p540_p9)  ;;  %v3817_v11 = vpack.c.bf16 (!%p540_p9), %v640_v7, %v639_v6  ;;  %v641_v15 = vld [vmem:[%s5464_s6 + $0x20] sm:$0xff] (!%p540_p9)  ;;  %v4293_v38 = vmov (!%p540_p9), 0.0   ;;  %s5499_s27 = sld [smem:[#allocation12_spill]] (!%p540_p9)  ;;  %vm989_vm1 = vcmask (!%p540_p9), 261120  }
  0x17   : > { %3815 = vmatpush3.bf16.msra.mxu0 (!%p540_p9), %v3814_v4  ;;  %v3841_v12 = vpack.c.bf16 (!%p540_p9), %v726_v10, %v725_v9  ;;  %v642_v16 = vld [vmem:[%s5464_s6 + $0x28] sm:$0xff] (!%p540_p9)  ;;  %v727_v17 = vld [vmem:[%s5465_s7 + $0x20] sm:$0xff] (!%p540_p9)  ;;  %v643_v21 = vld [vmem:[%s5464_s6 + $0x30] sm:$0xff] (!%p540_p9)  ;;  %3305 = vmatprep.mubr.msk.f32.mxu0 (!%p540_p9), %vm4292_vm0, %v4293_v38  ;;  %vm1230_vm3 = vcmask (!%p540_p9), 64512   ;;  %s591_s2 = sand.u32 (!%p540_p9), 1, %s4281_s30  }
  0x18   : > { %3839 = vmatpush3.bf16.msra.mxu1 (!%p540_p9), %v3838_v8  ;;  %3816 = vmatprep.subr.bf16.mxu0 (!%p540_p9), %v4291_v3  ;;  %v3820_v18 = vpack.c.bf16 (!%p540_p9), %v642_v16, %v641_v15  ;;  %v728_v19 = vld [vmem:[%s5465_s7 + $0x28] sm:$0xff] (!%p540_p9)  ;;  %v644_v22 = vld [vmem:[%s5464_s6 + $0x38] sm:$0xff] (!%p540_p9)  ;;  %v729_v23 = vld [vmem:[%s5465_s7 + $0x30] sm:$0xff] (!%p540_p9)  ;;  %s2864_s26 = sshll.u32 (!%p540_p9), %s591_s2, 3  ;;  %s2788_s0 = scalar_lea.sflag (!%p540_p9), [#allocation3], %s591_s2 }
  0x19   : > { %3840 = vmatprep.subr.bf16.mxu1 (!%p540_p9), %v4291_v3  ;;  %v3844_v20 = vpack.c.bf16 (!%p540_p9), %v728_v19, %v727_v17  ;;  %v3823_v24 = vpack.c.bf16 (!%p540_p9), %v644_v22, %v643_v21  ;;  %v730_v25 = vld [vmem:[%s5465_s7 + $0x38] sm:$0xff] (!%p540_p9)  ;;  %v645_v27 = vld [vmem:[%s5464_s6 + $0x40] sm:$0xff] (!%p540_p9)  ;;  %v646_v28 = vld [vmem:[%s5464_s6 + $0x48] sm:$0xff] (!%p540_p9)  ;;  %3340 = vmatprep.mubr.msk.f32.mxu1 (!%p540_p9), %vm4292_vm0, %v4293_v38  ;;  %s593_s24 = scalar_lea.vmem (!%p540_p9), [#allocation2], %s2864_s26 }
  0x1a   : > { %v3847_v26 = vpack.c.bf16 (!%p540_p9), %v730_v25, %v729_v23  ;;  %v731_v29 = vld [vmem:[%s5465_s7 + $0x40] sm:$0xff] (!%p540_p9)  ;;  %v3826_v30 = vpack.c.bf16 (!%p540_p9), %v646_v28, %v645_v27  ;;  %v732_v31 = vld [vmem:[%s5465_s7 + $0x48] sm:$0xff] (!%p540_p9)  ;;  %v647_v33 = vld [vmem:[%s5464_s6 + $0x50] sm:$0xff] (!%p540_p9) }
  0x1b   : > { %3818 = vmatpush3.bf16.msra.mxu0 (!%p540_p9), %v3817_v11  ;;  %v3850_v32 = vpack.c.bf16 (!%p540_p9), %v732_v31, %v731_v29  ;;  %v648_v34 = vld [vmem:[%s5464_s6 + $0x58] sm:$0xff] (!%p540_p9)  ;;  %v733_v35 = vld [vmem:[%s5465_s7 + $0x50] sm:$0xff] (!%p540_p9)  ;;  %v649_v40 = vld [vmem:[%s5464_s6 + $0x60] sm:$0xff] (!%p540_p9) }
  0x1c   : > { %s595_s23 = scalar_select %p594_p10, %s4416_s1, 1  ;;  %3842 = vmatpush3.bf16.msra.mxu1 %v3841_v12  ;;  %3819 = vmatprep.subr.bf16.mxu0 %v4291_v3  ;;  %v3829_v36 = vpack.c.bf16 %v648_v34, %v647_v33  ;;  %v734_v37 = vld [vmem:[%s5465_s7 + $0x58] sm:$0xff]  ;;  %v650_v41 = vld [vmem:[%s5464_s6 + $0x68] sm:$0xff]  ;;  %v735_v42 = vld [vmem:[%s5465_s7 + $0x60] sm:$0xff] }
  0x1d   : > { %3843 = vmatprep.subr.bf16.mxu1 %v4291_v3  ;;  %v3853_v39 = vpack.c.bf16 %v734_v37, %v733_v35  ;;  %v736_v43 = vld [vmem:[%s5465_s7 + $0x68] sm:$0xff]  ;;  %v3832_v44 = vpack.c.bf16 %v650_v41, %v649_v40  ;;  %v651_v46 = vld [vmem:[%s5464_s6 + $0x70] sm:$0xff]  ;;  %v652_v47 = vld [vmem:[%s5464_s6 + $0x78] sm:$0xff] }
  0x1e   : > { %s2865_s20 = sshll.u32 %s595_s23, 3  ;;  %v3856_v45 = vpack.c.bf16 %v736_v43, %v735_v42  ;;  %v737_v48 = vld [vmem:[%s5465_s7 + $0x70] sm:$0xff]  ;;  %v738_v49 = vld [vmem:[%s5465_s7 + $0x78] sm:$0xff]  ;;  %v3835_v50 = vpack.c.bf16 %v652_v47, %v651_v46  ;;  %v2866_v61 = vld [vmem:[%s5462_s4] ss:$0 sm:$0xff]  ;;  %s3012_s23 = sshll.u32 %s4416_s1, 7 }
  0x1f   : > { %s597_s29 = scalar_lea.vmem %s5498_s28, %s2865_s20  ;;  %3821 = vmatpush3.bf16.msra.mxu0 %v3820_v18  ;;  %v3859_v51 = vpack.c.bf16 %v738_v49, %v737_v48  ;;  %v809_v62 = vld [vmem:[%s5466_s8] sm:$0xff]  ;;  %v810_v0 = vld [vmem:[%s5466_s8 + $0x8] sm:$0xff]  ;;  %v811_v8 = vld [vmem:[%s5466_s8 + $0x10] sm:$0xff]  ;;  %s5502_s20 = sld [smem:[#allocation13_spill]] }
  0x20   : > { %v4476_v13 = vld [vmem:[%s597_s29] sm:$0xff]  ;;  %3845 = vmatpush3.bf16.msra.mxu1 %v3844_v20  ;;  %3822 = vmatprep.subr.bf16.mxu0 %v4291_v3  ;;  %v896_v2 = vld [vmem:[%s5467_s9 + $0x8] sm:$0xff]  ;;  %v3862_v6 = vpack.c.bf16 %v810_v0, %v809_v62  ;;  %v812_v10 = vld [vmem:[%s5466_s8 + $0x18] sm:$0xff]  ;;  %s5416_s29 = scalar_lea.hbm %s5477_s19, %s3012_s23  ;;  %s4294_s1 = smov [#allocation2]  }
  0x21   : > { %610 = vadd.xlane.f32.xlu0 %v4476_v13  ;;  %v613_v14 = vmul.f32 %v4476_v13, %v4476_v13  ;;  %3846 = vmatprep.subr.bf16.mxu1 %v4291_v3  ;;  %v895_v1 = vld [vmem:[%s5467_s9] sm:$0xff]  ;;  %v897_v11 = vld [vmem:[%s5467_s9 + $0x10] sm:$0xff]  ;;  %v898_v12 = vld [vmem:[%s5467_s9 + $0x18] sm:$0xff]  ;;  %s4231_s26 = sshll.u32 %s4294_s1, 4  ;;  %s4232_s26 = int_to_ptr.vmem [resolvable:$false] %s4231_s26 }
  0x22   : > { %v2867_v4 = vld [vmem:[%s5463_s5] ss:$0 sm:$0xff]  ;;  %v3886_v7 = vpack.c.bf16 %v896_v2, %v895_v1  ;;  %v3889_v15 = vpack.c.bf16 %v898_v12, %v897_v11  ;;  %v814_v17 = vld [vmem:[%s5466_s8 + $0x28] sm:$0xff]  ;;  %v815_v22 = vld [vmem:[%s5466_s8 + $0x30] sm:$0xff] }
  0x23   : > { %3824 = vmatpush3.bf16.msra.mxu0 %v3823_v24  ;;  %v813_v16 = vld [vmem:[%s5466_s8 + $0x20] sm:$0xff]  ;;  %v900_v19 = vld [vmem:[%s5467_s9 + $0x28] sm:$0xff]  ;;  %v816_v23 = vld [vmem:[%s5466_s8 + $0x38] sm:$0xff] }
  0x24   : > { %3848 = vmatpush3.bf16.msra.mxu1 %v3847_v26  ;;  %3825 = vmatprep.subr.bf16.mxu0 %v4291_v3  ;;  %v899_v18 = vld [vmem:[%s5467_s9 + $0x20] sm:$0xff]  ;;  %v3868_v20 = vpack.c.bf16 %v814_v17, %v813_v16  ;;  %v901_v24 = vld [vmem:[%s5467_s9 + $0x30] sm:$0xff]  ;;  %v902_v25 = vld [vmem:[%s5467_s9 + $0x38] sm:$0xff]  ;;  %v3871_v26 = vpack.c.bf16 %v816_v23, %v815_v22 }
  0x25   : > { %614 = vadd.xlane.f32.xlu0 %v613_v14  ;;  %3849 = vmatprep.subr.bf16.mxu1 %v4291_v3  ;;  %v3865_v14 = vpack.c.bf16 %v812_v10, %v811_v8  ;;  %v3892_v21 = vpack.c.bf16 %v900_v19, %v899_v18  ;;  %v3895_v27 = vpack.c.bf16 %v902_v25, %v901_v24  ;;  %v817_v28 = vld [vmem:[%s5466_s8 + $0x40] sm:$0xff]  ;;  %v818_v29 = vld [vmem:[%s5466_s8 + $0x48] sm:$0xff]  ;;  %v819_v34 = vld [vmem:[%s5466_s8 + $0x50] sm:$0xff]  ;;  %s5503_s25 = smov %s5502_s20 }
  0x26   : > { %v904_v31 = vld [vmem:[%s5467_s9 + $0x48] sm:$0xff]  ;;  %v820_v35 = vld [vmem:[%s5466_s8 + $0x58] sm:$0xff]  ;;  %v821_v41 = vld [vmem:[%s5466_s8 + $0x60] sm:$0xff] }
  0x27   : > { %3827 = vmatpush3.bf16.msra.mxu0 %v3826_v30  ;;  %v903_v30 = vld [vmem:[%s5467_s9 + $0x40] sm:$0xff]  ;;  %v906_v37 = vld [vmem:[%s5467_s9 + $0x58] sm:$0xff]  ;;  %v822_v42 = vld [vmem:[%s5466_s8 + $0x68] sm:$0xff] }
  0x28   : > { %3851 = vmatpush3.bf16.msra.mxu1 %v3850_v32  ;;  %3828 = vmatprep.subr.bf16.mxu0 %v4291_v3  ;;  %v3874_v32 = vpack.c.bf16 %v818_v29, %v817_v28  ;;  %v3898_v33 = vpack.c.bf16 %v904_v31, %v903_v30  ;;  %v907_v43 = vld [vmem:[%s5467_s9 + $0x60] sm:$0xff]  ;;  %v823_v47 = vld [vmem:[%s5466_s8 + $0x70] sm:$0xff]  ;;  %v824_v48 = vld [vmem:[%s5466_s8 + $0x78] sm:$0xff] }
  0x29   : > { %3852 = vmatprep.subr.bf16.mxu1 %v4291_v3  ;;  %v909_v49 = vld [vmem:[%s5467_s9 + $0x70] sm:$0xff]  ;;  %vm4718_vm2 = vmpackc.low %vm989_vm1, %vm989_vm1  ;;  %v4730_v0 = vld [vmem:[%s5499_s27 + $0x18] sm:$0xff] }
  0x2a   : > { %v606_v16 = vld [vmem:[%s5503_s25 + $0x10] sm:$0xff]  ;;  %v607_v18 = vld [vmem:[%s5503_s25 + $0x18] sm:$0xff]  ;;  %v1304_v31 = vld [vmem:[%s5468_s10] sm:$0xff] }
  0x2b   : > { %3830 = vmatpush3.bf16.msra.mxu0 %v3829_v36  ;;  %v905_v36 = vld [vmem:[%s5467_s9 + $0x50] sm:$0xff]  ;;  %v4760_v19 = vpack.c.bf16 %v607_v18, %v606_v16  ;;  %v1505_v16 = vld [vmem:[%s5473_s15 + $0x48] sm:$0xff] }
  0x2c   : > { %3854 = vmatpush3.bf16.msra.mxu1 %v3853_v39  ;;  %3831 = vmatprep.subr.bf16.mxu0 %v4291_v3  ;;  %v3877_v39 = vpack.c.bf16 %v820_v35, %v819_v34  ;;  %v3901_v40 = vpack.c.bf16 %v906_v37, %v905_v36  ;;  %v1306_v34 = vld [vmem:[%s5468_s10 + $0x10] sm:$0xff]  ;;  %v1307_v35 = vld [vmem:[%s5468_s10 + $0x18] sm:$0xff] }
  0x2d   : > { %3855 = vmatprep.subr.bf16.mxu1 %v4291_v3  ;;  %v3939_v36 = vpack.c.bf16 %v1307_v35, %v1306_v34  ;;  %v1506_v18 = vld [vmem:[%s5473_s15 + $0x50] sm:$0xff] }
  0x2f   : > { %3833 = vmatpush3.bf16.msra.mxu0 %v3832_v44  ;;  %v908_v44 = vld [vmem:[%s5467_s9 + $0x68] sm:$0xff] }
  0x30   : > { %3857 = vmatpush3.bf16.msra.mxu1 %v3856_v45  ;;  %3834 = vmatprep.subr.bf16.mxu0 %v4291_v3  ;;  %v3880_v45 = vpack.c.bf16 %v822_v42, %v821_v41  ;;  %v3904_v46 = vpack.c.bf16 %v908_v44, %v907_v43  ;;  %v1309_v41 = vld [vmem:[%s5469_s11 + $0x8] sm:$0xff] }
  0x31   : > { %3858 = vmatprep.subr.bf16.mxu1 %v4291_v3 }
  0x33   : > { %3836 = vmatpush3.bf16.msra.mxu0 %v3835_v50  ;;  %v910_v50 = vld [vmem:[%s5467_s9 + $0x78] sm:$0xff] }
  0x34   : > { %3860 = vmatpush3.bf16.msra.mxu1 %v3859_v51  ;;  %3861 = vmatprep.subr.bf16.mxu0 %v4291_v3  ;;  %v3883_v51 = vpack.c.bf16 %v824_v48, %v823_v47 }
  0x35   : > { %3885 = vmatprep.subr.bf16.mxu1 %v4291_v3 }
  0xae   : > { %v611_v52 = vpop.xlane.xlu0 %610 }
  0xaf   : > { %v612_v53 = vmul.f32 0.03125, %v611_v52  ;;  %v3907_v52 = vpack.c.bf16 %v910_v50, %v909_v49 }
  0xb1   : > { %v617_v55 = vmul.f32 %v612_v53, %v612_v53  ;;  %v619_v59 = vsub.f32 %v4476_v13, %v612_v53  ;;  %v4707_v53 = vld [vmem:[%s5499_s27] sm:$0xff] }
  0xb2   : > { %v615_v54 = vpop.xlane.xlu0 %614 }
  0xb3   : > { %v616_v56 = vmul.f32 0.03125, %v615_v54  ;;  %v4712_v54 = vld [vmem:[%s5499_s27 + $0x8] sm:$0xff] }
  0xb5   : > { %v618_v57 = vsub.f32 %v616_v56, %v617_v55 }
  0xb7   : > { %v620_v58 = vadd.f32 1e-05, %v618_v57 }
  0xb9   : > { %4207 = vrsqrt.f32 %v620_v58 }
  0xc3   : > { %v4208_v60 = vpop.eup %4207 }
  0xc4   : > { %v622_v63 = vmul.f32 %v4208_v60, %v619_v59 }
  0xc6   : > { %v629_v5 = vmul.f32 %v2866_v61, %v622_v63  ;;  %v4725_v63 = vld [vmem:[%s5499_s27 + $0x10] sm:$0xff]  ;;  %s4233_s27 = scalar_lea.vmem %s4232_s26, 256 }
  0xc8   : > { %v4593_v9 = vadd.f32 %v2867_v4, %v629_v5 }
  0xca   : > { %3306 = vmatmul.mubr.f32.vlgmr.msra.gmra.mrb[0].mxu0 %v4593_v9  ;;  %3341 = vmatmul.mubr.f32.vlgmr.msra.gmra.mrb[0].mxu1 %v4593_v9 }
  0xcb   : > { %3863 = vmatpush3.bf16.msra.mxu0 %v3862_v6  ;;  %3887 = vmatpush3.bf16.msra.mxu1 %v3886_v7 }
  0xcc   : > { %3864 = vmatprep.subr.bf16.mxu0 %v4291_v3  ;;  %3888 = vmatprep.subr.bf16.mxu1 %v4291_v3 }
  0xcd   : > { %3375 = vmatprep.mubr.msk.f32.mxu0 %vm4292_vm0, %v4293_v38  ;;  %3410 = vmatprep.mubr.msk.f32.mxu1 %vm4292_vm0, %v4293_v38 }
  0xcf   : > { %3866 = vmatpush3.bf16.msra.mxu0 %v3865_v14  ;;  %3890 = vmatpush3.bf16.msra.mxu1 %v3889_v15  ;;  %v604_v14 = vld [vmem:[%s5502_s20] sm:$0xff]  ;;  %v605_v15 = vld [vmem:[%s5503_s25 + $0x8] sm:$0xff]  ;;  %s5504_s20 = sld [smem:[#allocation11_spill]] }
  0xd0   : > { %3867 = vmatprep.subr.bf16.mxu0 %v4291_v3  ;;  %3891 = vmatprep.subr.bf16.mxu1 %v4291_v3  ;;  %v4754_v17 = vpack.c.bf16 %v605_v15, %v604_v14  ;;  %v1504_v15 = vld [vmem:[%s5473_s15 + $0x40] sm:$0xff] }
  0xd3   : > { %3869 = vmatpush3.bf16.msra.mxu0 %v3868_v20  ;;  %3893 = vmatpush3.bf16.msra.mxu1 %v3892_v21 }
  0xd4   : > { %3870 = vmatprep.subr.bf16.mxu0 %v4291_v3  ;;  %3894 = vmatprep.subr.bf16.mxu1 %v4291_v3 }
  0xd5   : > { %v4777_v30 = vld [vmem:[%s5504_s20] sm:$0xff]  ;;  %s2801_s20 = sshll.u32 %s593_s24, 4  ;;  %s5418_s20 = int_to_ptr.vmem [resolvable:$true] %s2801_s20 }
  0xd6   : > { %s4227_s22 = scalar_lea.vmem %s5418_s20, 128  ;;  %p4234_p0 = scmp.lt.s32.totalorder %s5418_s20, %s4232_s26 }
  0xd7   : > { %3872 = vmatpush3.bf16.msra.mxu0 %v3871_v26  ;;  %3896 = vmatpush3.bf16.msra.mxu1 %v3895_v27  ;;  %p4228_p11 = scmp.ne.s32.totalorder %s5418_s20, %s4227_s22  ;;  %p4235_p1 = scmp.lt.s32.totalorder %s4233_s27, %s4227_s22 }
  0xd8   : > { %3873 = vmatprep.subr.bf16.mxu0 %v4291_v3  ;;  %3897 = vmatprep.subr.bf16.mxu1 %v4291_v3 }
  0xd9   : > { %p4229_p12 = pnand %p4228_p11, %p4433_p5  ;;  %p4236_p2 = por %p4235_p1, %p4234_p0 }
  0xdb   : > { %3875 = vmatpush3.bf16.msra.mxu0 %v3874_v32  ;;  %3899 = vmatpush3.bf16.msra.mxu1 %v3898_v33  ;;  %v1305_v32 = vld [vmem:[%s5468_s10 + $0x8] sm:$0xff]  ;;  %p4230_p13 = pneg %p4229_p12 }
  0xdc   : > { %3876 = vmatprep.subr.bf16.mxu0 %v4291_v3  ;;  %3900 = vmatprep.subr.bf16.mxu1 %v4291_v3  ;;  %v3936_v33 = vpack.c.bf16 %v1305_v32, %v1304_v31  ;;  %v1599_v31 = vld [vmem:[%s5475_s17 + $0x8] sm:$0xff] }
  0xdd   : > { %p4237_p3 = pnand %p4236_p2, %p4230_p13 }
  0xdf   : > { %3878 = vmatpush3.bf16.msra.mxu0 %v3877_v39  ;;  %3902 = vmatpush3.bf16.msra.mxu1 %v3901_v40  ;;  %v1308_v40 = vld [vmem:[%s5469_s11] sm:$0xff] }
  0xe0   : > { %3879 = vmatprep.subr.bf16.mxu0 %v4291_v3  ;;  %3903 = vmatprep.subr.bf16.mxu1 %v4291_v3  ;;  %v3930_v43 = vpack.c.bf16 %v1309_v41, %v1308_v40 }
  0xe3   : > { %3881 = vmatpush3.bf16.msra.mxu0 %v3880_v45  ;;  %3905 = vmatpush3.bf16.msra.mxu1 %v3904_v46  ;;  %v1310_v45 = vld [vmem:[%s5469_s11 + $0x10] sm:$0xff]  ;;  %v1311_v46 = vld [vmem:[%s5469_s11 + $0x18] sm:$0xff] }
  0xe4   : > { %3882 = vmatprep.subr.bf16.mxu0 %v4291_v3  ;;  %3906 = vmatprep.subr.bf16.mxu1 %v4291_v3  ;;  %v3933_v47 = vpack.c.bf16 %v1311_v46, %v1310_v45  ;;  %v2880_v45 = vld [vmem:[%s5472_s14] ss:$0 sm:$0xff] }
  0xe7   : > { %3884 = vmatpush3.bf16.msra.mxu0 %v3883_v51  ;;  %3908 = vmatpush3.bf16.msra.mxu1 %v3907_v52 }
  0xe8   : > { %3909 = vmatprep.subr.bf16.mxu0 %v4291_v3  ;;  %3917 = vmatprep.subr.bf16.mxu1 %v4291_v3 }
  0xea   : > { %3376 = vmatmul.mubr.f32.vlgmr.msra.gmra.mrb[2].mxu0 %v4593_v9  ;;  %3411 = vmatmul.mubr.f32.vlgmr.msra.gmra.mrb[2].mxu1 %v4593_v9 }
  0xeb   : > { %3421 = vmatprep.mubr.msk.f32.mxu0 %vm4292_vm0, %v4293_v38  ;;  %3432 = vmatprep.mubr.msk.f32.mxu1 %vm4292_vm0, %v4293_v38 }
  0xec   : > { %3919 = vmatpush3.bf16.msra.mxu1 %v4754_v17 }
  0xed   : > { %3920 = vmatprep.subr.bf16.mxu1 %v4291_v3 }
  0xf0   : > { %3922 = vmatpush3.bf16.msra.mxu1 %v4760_v19 }
  0xf1   : > { %3923 = vmatprep.subr.bf16.mxu1 %v4291_v3 }
 0x19d   : > { %v719_v55 = vpop.f32.mrb[0].mxu0  ;;  %v805_v56 = vpop.f32.mrb[0].mxu1 }
 0x19e   : > { %v981_v57 = vmul.f32 %v805_v56, %v4707_v53  ;;  %v982_v58 = vmul.f32 %v805_v56, %v4712_v54  ;;  %v3307_v59 = vpop.f32.mrb[1].mxu0  ;;  %v3342_v60 = vpop.f32.mrb[1].mxu1  ;;  %v983_v1 = vmul.f32 %v805_v56, %v4725_v63  ;;  %v984_v2 = vmul.f32 %v805_v56, %v4730_v0  ;;  %v1496_v56 = vld [vmem:[%s5473_s15] sm:$0xff] }
 0x19f   : > { %v1499_v60 = vld [vmem:[%s5473_s15 + $0x18] sm:$0xff] }
 0x1a0   : > { %v3910_v62 = vpack.c.bf16 %v982_v58, %v981_v57  ;;  %v3914_v4 = vpack.c.bf16 %v984_v2, %v983_v1  ;;  %v1497_v57 = vld [vmem:[%s5473_s15 + $0x8] sm:$0xff]  ;;  %v1498_v58 = vld [vmem:[%s5473_s15 + $0x10] sm:$0xff]  ;;  %v2878_v2 = vld [vmem:[%s5470_s12] ss:$0 sm:$0xff] }
 0x1a1   : > { %v3942_v59 = vpack.c.bf16 %v1497_v57, %v1496_v56  ;;  %v1604_v56 = vld [vmem:[%s5475_s17 + $0x30] sm:$0xff]  ;;  %v1605_v57 = vld [vmem:[%s5475_s17 + $0x38] sm:$0xff] }
 0x1a2   : > { %3912 = vmatpush3.bf16.xpose.msk.msra.mxu0 %vm4718_vm2, %v3910_v62  ;;  %v3945_v62 = vpack.c.bf16 %v1499_v60, %v1498_v58  ;;  %v3975_v58 = vpack.c.bf16 %v1605_v57, %v1604_v56  ;;  %v1607_v60 = vld [vmem:[%s5475_s17 + $0x48] sm:$0xff]  ;;  %v2909_v56 = vld [vmem:[%s5465_s7 + $0xb0] sm:$0xff] }
 0x1a3   : > { %3913 = vmatprep.subr.bf16.mxu0 %v4291_v3 }
 0x1aa   : > { %3916 = vmatpush3.bf16.xpose.msk.msra.mxu0 %vm4718_vm2, %v3914_v4 }
 0x1ab   : > { %3446 = vmatprep.subr.mxu0 %v4293_v38 }
 0x1b1   : > { %3422 = vmatmul.mubr.msk.f32.vlgmr.msra.gmra.mrb[4].mxu0 %vm989_vm1, %v719_v55 }
 0x1b2   : > { %3448 = vmatprep.mubr.msk.f32.mxu0 %vm4292_vm0, %v4293_v38 }
 0x1bd   : > { %v891_v5 = vpop.f32.mrb[2].mxu0  ;;  %v977_v6 = vpop.f32.mrb[2].mxu1 }
 0x1be   : > { %v3377_v7 = vpop.f32.mrb[3].mxu0  ;;  %v3412_v8 = vpop.f32.mrb[3].mxu1  ;;  %3447 = vmatpush3.msra.mxu0 %v977_v6  ;;  %v985_v23 = vmul.f32 %v891_v5, %v4707_v53  ;;  %v986_v24 = vmul.f32 %v891_v5, %v4712_v54  ;;  %v987_v26 = vmul.f32 %v891_v5, %v4725_v63  ;;  %v988_v27 = vmul.f32 %v891_v5, %v4730_v0 }
 0x1bf   : > { %3935 = vmatprep.subr.bf16.mxu0 %v4291_v3  ;;  %3449 = vmatmul.mubr.msk.f32.vlgmr.msra.gmra.mrb[6].mxu0 %vm1230_vm3, %v4777_v30 }
 0x1c0   : > { %v3924_v28 = vpack.c.bf16 %v986_v24, %v985_v23  ;;  %v3927_v29 = vpack.c.bf16 %v988_v27, %v987_v26  ;;  %3470 = vmatprep.mubr.msk.f32.mxu0 %vm4292_vm0, %v4293_v38  ;;  %3937 = vmatpush3.bf16.msra.mxu0 %v3936_v33  ;;  %v1508_v23 = vld [vmem:[%s5473_s15 + $0x60] sm:$0xff]  ;;  %v1509_v24 = vld [vmem:[%s5473_s15 + $0x68] sm:$0xff]  ;;  %v1510_v26 = vld [vmem:[%s5473_s15 + $0x70] sm:$0xff] }
 0x1c1   : > { %3938 = vmatprep.subr.bf16.mxu0 %v4291_v3  ;;  %v1511_v27 = vld [vmem:[%s5473_s15 + $0x78] sm:$0xff] }
 0x1c4   : > { %3940 = vmatpush3.bf16.msra.mxu0 %v3939_v36 }
 0x1c5   : > { %3965 = vmatprep.subr.bf16.mxu0 %v4291_v3 }
 0x284   : > { %v1071_v9 = vpop.f32.mrb[4].mxu0 }
 0x285   : > { %v1075_v10 = vmul.f32 0.35355338, %v1071_v9  ;;  %v3423_v11 = vpop.f32.mrb[5].mxu0  ;;  %v1500_v9 = vld [vmem:[%s5473_s15 + $0x20] sm:$0xff] }
 0x287   : > { %v1076_v12 = vsel %vm989_vm1, %v1075_v10, -inf }
 0x288   : > { %1077 = vmax.xlane.f32.xlu1 %v1076_v12  ;;  %v1503_v12 = vld [vmem:[%s5473_s15 + $0x38] sm:$0xff] }
 0x292   : > { %v1300_v48 = vpop.f32.mrb[6].mxu0 }
 0x293   : > { %v3450_v49 = vpop.f32.mrb[7].mxu0 }
 0x294   : > { %v1601_v49 = vld [vmem:[%s5475_s17 + $0x18] sm:$0xff] }
 0x315   : > { %v1078_v20 = vpop.xlane.xlu1 %1077 }
 0x316   : > { %v1079_v21 = vsub.f32 %v1075_v10, %v1078_v20  ;;  %v1501_v10 = vld [vmem:[%s5473_s15 + $0x28] sm:$0xff]  ;;  %v3954_v20 = vpack.c.bf16 %v1505_v16, %v1504_v15 }
 0x317   : > { %v3948_v11 = vpack.c.bf16 %v1501_v10, %v1500_v9  ;;  %v1612_v9 = vld [vmem:[%s5475_s17 + $0x70] sm:$0xff]  ;;  %v1613_v10 = vld [vmem:[%s5475_s17 + $0x78] sm:$0xff] }
 0x318   : > { %v1080_v22 = vmul.f32 1.442695, %v1079_v21  ;;  %v1507_v21 = vld [vmem:[%s5473_s15 + $0x58] sm:$0xff] }
 0x31a   : > { %4209 = vpow2.f32 %v1080_v22  ;;  %v3957_v22 = vpack.c.bf16 %v1507_v21, %v1506_v18 }
 0x324   : > { %v4210_v25 = vpop.eup %4209 }
 0x325   : > { %3433 = vmatmul.mubr.msk.f32.vlgmr.msra.gmra.mrb[4].mxu1 %vm989_vm1, %v4210_v25 }
 0x326   : > { %3925 = vmatpush3.bf16.msra.mxu1 %v3924_v28  ;;  %3443 = vmatprep.mubr.msk.f32.mxu1 %vm4292_vm0, %v4293_v38  ;;  %v3963_v28 = vpack.c.bf16 %v1511_v27, %v1510_v26  ;;  %v2887_v27 = vld [vmem:[%s5464_s6 + $0x80] sm:$0xff] }
 0x327   : > { %3926 = vmatprep.subr.bf16.mxu1 %v4291_v3 }
 0x32a   : > { %3928 = vmatpush3.bf16.msra.mxu1 %v3927_v29  ;;  %v1598_v29 = vld [vmem:[%s5475_s17] sm:$0xff] }
 0x32b   : > { %3929 = vmatprep.subr.bf16.mxu1 %v4291_v3  ;;  %v3966_v32 = vpack.c.bf16 %v1599_v31, %v1598_v29  ;;  %v2903_v29 = vld [vmem:[%s5465_s7 + $0x80] sm:$0xff] }
 0x3f8   : > { %v1151_v37 = vpop.f32.mrb[4].mxu1 }
 0x3f9   : > { %4211 = vrcp.f32 %v1151_v37  ;;  %v3434_v39 = vpop.f32.mrb[5].mxu1 }
 0x403   : > { %v4212_v42 = vpop.eup %4211 }
 0x404   : > { %v1156_v44 = vmul.f32 %v4212_v42, %v4210_v25  ;;  %v3960_v25 = vpack.c.bf16 %v1509_v24, %v1508_v23 }
 0x406   : > { %3444 = vmatmul.mubr.msk.f32.vlgmr.msra.gmra.mrb[6].mxu1 %vm989_vm1, %v1156_v44 }
 0x407   : > { %3931 = vmatpush3.bf16.msra.mxu1 %v3930_v43  ;;  %3459 = vmatprep.mubr.msk.f32.mxu1 %vm4292_vm0, %v4293_v38  ;;  %v2879_v43 = vld [vmem:[%s5471_s13] ss:$0 sm:$0xff] }
 0x408   : > { %3932 = vmatprep.subr.bf16.mxu1 %v4291_v3 }
 0x40b   : > { %3934 = vmatpush3.bf16.msra.mxu1 %v3933_v47 }
 0x40c   : > { %3941 = vmatprep.subr.bf16.mxu1 %v4291_v3 }
 0x40e   : > { %3460 = vmatmul.mubr.msk.f32.vlgmr.msra.gmra.mrb[8].mxu1 %vm989_vm1, %v1300_v48  ;;  %v1600_v48 = vld [vmem:[%s5475_s17 + $0x10] sm:$0xff] }
 0x40f   : > { %3505 = vmatprep.mubr.msk.f32.mxu1 %vm4292_vm0, %v4293_v38  ;;  %3943 = vmatpush3.bf16.msra.mxu1 %v3942_v59  ;;  %v1606_v59 = vld [vmem:[%s5475_s17 + $0x40] sm:$0xff] }
 0x410   : > { %3944 = vmatprep.subr.bf16.mxu1 %v4291_v3 }
 0x413   : > { %3946 = vmatpush3.bf16.msra.mxu1 %v3945_v62  ;;  %v3978_v62 = vpack.c.bf16 %v1607_v60, %v1606_v59  ;;  %v2895_v60 = vld [vmem:[%s5464_s6 + $0xc0] sm:$0xff] }
 0x414   : > { %3947 = vmatprep.subr.bf16.mxu1 %v4291_v3 }
 0x417   : > { %3949 = vmatpush3.bf16.msra.mxu1 %v3948_v11  ;;  %v3987_v11 = vpack.c.bf16 %v1613_v10, %v1612_v9  ;;  %v2913_v9 = vld [vmem:[%s5465_s7 + $0xd0] sm:$0xff]  ;;  %v2914_v10 = vld [vmem:[%s5465_s7 + $0xd8] sm:$0xff] }
 0x418   : > { %3950 = vmatprep.subr.bf16.mxu1 %v4291_v3 }
 0x4d9   : > { %v1226_v50 = vpop.f32.mrb[6].mxu1 }
 0x4da   : > { %v3445_v51 = vpop.f32.mrb[7].mxu1  ;;  %3471 = vmatmul.mubr.msk.f32.vlgmr.msra.gmra.mrb[8].mxu0 %vm989_vm1, %v1226_v50  ;;  %v3969_v50 = vpack.c.bf16 %v1601_v49, %v1600_v48  ;;  %v2892_v48 = vld [vmem:[%s5464_s6 + $0xa8] sm:$0xff]  ;;  %v2907_v49 = vld [vmem:[%s5465_s7 + $0xa0] sm:$0xff] }
 0x4db   : > { %3540 = vmatprep.mubr.msk.f32.mxu0 %vm4292_vm0, %v4293_v38  ;;  %3967 = vmatpush3.bf16.msra.mxu0 %v3966_v32  ;;  %v1602_v51 = vld [vmem:[%s5475_s17 + $0x20] sm:$0xff]  ;;  %v2904_v32 = vld [vmem:[%s5465_s7 + $0x88] sm:$0xff] }
 0x4dc   : > { %3968 = vmatprep.subr.bf16.mxu0 %v4291_v3 }
 0x4df   : > { %3970 = vmatpush3.bf16.msra.mxu0 %v3969_v50  ;;  %v2908_v50 = vld [vmem:[%s5465_s7 + $0xa8] sm:$0xff] }
 0x4e0   : > { %3971 = vmatprep.subr.bf16.mxu0 %v4291_v3 }
 0x4e1   : > { %v1381_v52 = vpop.f32.mrb[8].mxu1 }
 0x4e2   : > { %v3461_v55 = vpop.f32.mrb[9].mxu1 }
 0x5ad   : > { %v1454_v1 = vpop.f32.mrb[8].mxu0 }
 0x5ae   : > { %v1455_v4 = vadd.f32 %v1454_v1, %v1381_v52  ;;  %v3472_v5 = vpop.f32.mrb[9].mxu0  ;;  %v1603_v52 = vld [vmem:[%s5475_s17 + $0x28] sm:$0xff]  ;;  %v1608_v1 = vld [vmem:[%s5475_s17 + $0x50] sm:$0xff] }
 0x5af   : > { %v3972_v55 = vpack.c.bf16 %v1603_v52, %v1602_v51  ;;  %v1610_v5 = vld [vmem:[%s5475_s17 + $0x60] sm:$0xff]  ;;  %v4020_v51 = vpack.c.bf16 %v2908_v50, %v2907_v49  ;;  %v2893_v52 = vld [vmem:[%s5464_s6 + $0xb0] sm:$0xff]  ;;  %v2922_v50 = vld [vmem:[%s5466_s8 + $0x98] sm:$0xff] }
 0x5b0   : > { %v1465_v6 = vadd.f32 %v2878_v2, %v1455_v4  ;;  %v1609_v2 = vld [vmem:[%s5475_s17 + $0x58] sm:$0xff]  ;;  %v2921_v49 = vld [vmem:[%s5466_s8 + $0x90] sm:$0xff] }
 0x5b1   : > { %3973 = vmatpush3.bf16.msra.mxu0 %v3972_v55  ;;  %v3981_v4 = vpack.c.bf16 %v1609_v2, %v1608_v1  ;;  %v2894_v55 = vld [vmem:[%s5464_s6 + $0xb8] sm:$0xff]  ;;  %v2911_v1 = vld [vmem:[%s5465_s7 + $0xc0] sm:$0xff] }
 0x5b2   : > { %v4838_v7 = vadd.f32 %v1465_v6, %v4476_v13  ;;  %v1502_v13 = vld [vmem:[%s5473_s15 + $0x30] sm:$0xff]  ;;  %3974 = vmatprep.subr.bf16.mxu0 %v4291_v3  ;;  %v1611_v6 = vld [vmem:[%s5475_s17 + $0x68] sm:$0xff]  ;;  %v3999_v57 = vpack.c.bf16 %v2894_v55, %v2893_v52  ;;  %v2938_v52 = vld [vmem:[%s5467_s9 + $0x98] sm:$0xff]  ;;  %v4041_v55 = vpack.c.bf16 %v2922_v50, %v2921_v49 }
 0x5b3   : > { %v3951_v14 = vpack.c.bf16 %v1503_v12, %v1502_v13  ;;  %v2881_v13 = vld [vmem:[%s5474_s16] ss:$0 sm:$0xff] }
 0x5b4   : > { %1469 = vadd.xlane.f32.xlu1 %v4838_v7  ;;  %v1472_v8 = vmul.f32 %v4838_v7, %v4838_v7 }
 0x5b5   : > { %3952 = vmatpush3.bf16.msra.mxu1 %v3951_v14  ;;  %3976 = vmatpush3.bf16.msra.mxu0 %v3975_v58  ;;  %v2910_v58 = vld [vmem:[%s5465_s7 + $0xb8] sm:$0xff] }
 0x5b6   : > { %1473 = vadd.xlane.f32.xlu0 %v1472_v8  ;;  %3953 = vmatprep.subr.bf16.mxu1 %v4291_v3  ;;  %v3984_v8 = vpack.c.bf16 %v1611_v6, %v1610_v5  ;;  %v4023_v59 = vpack.c.bf16 %v2910_v58, %v2909_v56  ;;  %v2897_v5 = vld [vmem:[%s5464_s6 + $0xd0] sm:$0xff]  ;;  %v2898_v6 = vld [vmem:[%s5464_s6 + $0xd8] sm:$0xff]  ;;  %v2924_v58 = vld [vmem:[%s5466_s8 + $0xa8] sm:$0xff] }
 0x5b7   : > { %3977 = vmatprep.subr.bf16.mxu0 %v4291_v3 }
 0x5b9   : > { %3955 = vmatpush3.bf16.msra.mxu1 %v3954_v20  ;;  %3979 = vmatpush3.bf16.msra.mxu0 %v3978_v62  ;;  %v2896_v62 = vld [vmem:[%s5464_s6 + $0xc8] sm:$0xff] }
 0x5ba   : > { %3956 = vmatprep.subr.bf16.mxu1 %v4291_v3  ;;  %3980 = vmatprep.subr.bf16.mxu0 %v4291_v3  ;;  %v4002_v2 = vpack.c.bf16 %v2896_v62, %v2895_v60  ;;  %v2940_v60 = vld [vmem:[%s5467_s9 + $0xa8] sm:$0xff] }
 0x5bd   : > { %3958 = vmatpush3.bf16.msra.mxu1 %v3957_v22  ;;  %3982 = vmatpush3.bf16.msra.mxu0 %v3981_v4  ;;  %v2912_v4 = vld [vmem:[%s5465_s7 + $0xc8] sm:$0xff] }
 0x5be   : > { %3959 = vmatprep.subr.bf16.mxu1 %v4291_v3  ;;  %3983 = vmatprep.subr.bf16.mxu0 %v4291_v3 }
 0x5c1   : > { %3961 = vmatpush3.bf16.msra.mxu1 %v3960_v25  ;;  %3985 = vmatpush3.bf16.msra.mxu0 %v3984_v8  ;;  %v4026_v8 = vpack.c.bf16 %v2912_v4, %v2911_v1  ;;  %v2926_v4 = vld [vmem:[%s5466_s8 + $0xb8] sm:$0xff] }
 0x5c2   : > { %3962 = vmatprep.subr.bf16.mxu1 %v4291_v3  ;;  %3986 = vmatprep.subr.bf16.mxu0 %v4291_v3 }
 0x5c5   : > { %3964 = vmatpush3.bf16.msra.mxu1 %v3963_v28  ;;  %3988 = vmatpush3.bf16.msra.mxu0 %v3987_v11  ;;  %v2888_v28 = vld [vmem:[%s5464_s6 + $0x88] sm:$0xff]  ;;  %v4005_v11 = vpack.c.bf16 %v2898_v6, %v2897_v5  ;;  %v2941_v5 = vld [vmem:[%s5467_s9 + $0xb0] sm:$0xff]  ;;  %v2942_v6 = vld [vmem:[%s5467_s9 + $0xb8] sm:$0xff] }
 0x5c6   : > { %3989 = vmatprep.subr.bf16.mxu1 %v4291_v3  ;;  %4013 = vmatprep.subr.bf16.mxu0 %v4291_v3  ;;  %v3990_v31 = vpack.c.bf16 %v2888_v28, %v2887_v27 }
 0x641   : > { %v1470_v33 = vpop.xlane.xlu1 %1469 }
 0x642   : > { %v1471_v34 = vmul.f32 0.03125, %v1470_v33  ;;  %v2889_v33 = vld [vmem:[%s5464_s6 + $0x90] sm:$0xff] }
 0x643   : > { %v1474_v35 = vpop.xlane.xlu0 %1473 }
 0x644   : > { %v1476_v36 = vmul.f32 %v1471_v34, %v1471_v34  ;;  %v1475_v37 = vmul.f32 0.03125, %v1474_v35  ;;  %v1478_v41 = vsub.f32 %v4838_v7, %v1471_v34  ;;  %v2890_v34 = vld [vmem:[%s5464_s6 + $0x98] sm:$0xff]  ;;  %v4014_v35 = vpack.c.bf16 %v2904_v32, %v2903_v29 }
 0x646   : > { %v1477_v39 = vsub.f32 %v1475_v37, %v1476_v36  ;;  %v2905_v36 = vld [vmem:[%s5465_s7 + $0x90] sm:$0xff]  ;;  %v2906_v37 = vld [vmem:[%s5465_s7 + $0x98] sm:$0xff] }
 0x648   : > { %v1479_v40 = vadd.f32 1e-05, %v1477_v39  ;;  %v3993_v39 = vpack.c.bf16 %v2890_v34, %v2889_v33 }
 0x64a   : > { %4213 = vrsqrt.f32 %v1479_v40  ;;  %v4017_v40 = vpack.c.bf16 %v2906_v37, %v2905_v36  ;;  %v2885_v37 = vld [vmem:[%s5462_s4 + $0x1] ss:$0 sm:$0xff] }
 0x654   : > { %v4214_v42 = vpop.eup %4213 }
 0x655   : > { %v1481_v44 = vmul.f32 %v4214_v42, %v1478_v41  ;;  %v2882_v41 = vld [vmem:[%s5476_s18] ss:$0 sm:$0xff] }
 0x657   : > { %v1488_v46 = vmul.f32 %v2879_v43, %v1481_v44 }
 0x659   : > { %v1495_v47 = vadd.f32 %v2880_v45, %v1488_v46 }
 0x65b   : > { %3506 = vmatmul.mubr.f32.vlgmr.msra.gmra.mrb[10].mxu1 %v1495_v47  ;;  %v2891_v47 = vld [vmem:[%s5464_s6 + $0xa0] sm:$0xff] }
 0x65c   : > { %3575 = vmatprep.mubr.msk.f32.mxu1 %vm4292_vm0, %v4293_v38  ;;  %3991 = vmatpush3.bf16.msra.mxu1 %v3990_v31 }
 0x65d   : > { %3992 = vmatprep.subr.bf16.mxu1 %v4291_v3 }
 0x660   : > { %3994 = vmatpush3.bf16.msra.mxu1 %v3993_v39  ;;  %v2919_v39 = vld [vmem:[%s5466_s8 + $0x80] sm:$0xff] }
 0x661   : > { %3995 = vmatprep.subr.bf16.mxu1 %v4291_v3 }
 0x72e   : > { %v1585_v12 = vpop.f32.mrb[10].mxu1 }
 0x72f   : > { %v1586_v14 = vadd.f32 %v2881_v13, %v1585_v12  ;;  %v3507_v15 = vpop.f32.mrb[11].mxu1  ;;  %v4029_v13 = vpack.c.bf16 %v2914_v10, %v2913_v9  ;;  %v2899_v12 = vld [vmem:[%s5464_s6 + $0xe0] sm:$0xff]  ;;  %v4071_v9 = vpack.c.bf16 %v2942_v6, %v2941_v5 }
 0x730   : > { %v2915_v15 = vld [vmem:[%s5465_s7 + $0xe0] sm:$0xff] }
 0x731   : > { %v1590_v16 = vmul.f32 0.044715, %v1586_v14  ;;  %v1589_v24 = vmul.f32 0.5, %v1586_v14  ;;  %v2927_v10 = vld [vmem:[%s5466_s8 + $0xc0] sm:$0xff] }
 0x733   : > { %v1591_v18 = vmul.f32 %v1590_v16, %v1586_v14  ;;  %v2916_v16 = vld [vmem:[%s5465_s7 + $0xe8] sm:$0xff] }
 0x735   : > { %v1592_v20 = vmul.f32 %v1591_v18, %v1586_v14 }
 0x737   : > { %v1593_v21 = vadd.f32 %v1592_v20, %v1586_v14  ;;  %v2900_v14 = vld [vmem:[%s5464_s6 + $0xe8] sm:$0xff]  ;;  %v4032_v20 = vpack.c.bf16 %v2916_v16, %v2915_v15  ;;  %v2929_v16 = vld [vmem:[%s5466_s8 + $0xd0] sm:$0xff] }
 0x738   : > { %v4008_v18 = vpack.c.bf16 %v2900_v14, %v2899_v12  ;;  %v2944_v12 = vld [vmem:[%s5467_s9 + $0xc8] sm:$0xff] }
 0x739   : > { %v1594_v22 = vmul.f32 0.7978846, %v1593_v21  ;;  %v2901_v21 = vld [vmem:[%s5464_s6 + $0xf0] sm:$0xff] }
 0x73b   : > { %4215 = vtanh.f32 %v1594_v22  ;;  %v2902_v22 = vld [vmem:[%s5464_s6 + $0xf8] sm:$0xff] }
 0x745   : > { %v4216_v23 = vpop.eup %4215 }
 0x746   : > { %v1596_v25 = vadd.f32 1.0, %v4216_v23  ;;  %v2917_v23 = vld [vmem:[%s5465_s7 + $0xf0] sm:$0xff] }
 0x748   : > { %v1597_v26 = vmul.f32 %v1596_v25, %v1589_v24  ;;  %v2918_v24 = vld [vmem:[%s5465_s7 + $0xf8] sm:$0xff]  ;;  %v4011_v25 = vpack.c.bf16 %v2902_v22, %v2901_v21 }
 0x749   : > { %v2946_v21 = vld [vmem:[%s5467_s9 + $0xd8] sm:$0xff] }
 0x74a   : > { %3541 = vmatmul.mubr.f32.vlgmr.msra.gmra.mrb[10].mxu0 %v1597_v26  ;;  %v4035_v26 = vpack.c.bf16 %v2918_v24, %v2917_v23  ;;  %v2931_v24 = vld [vmem:[%s5466_s8 + $0xe0] sm:$0xff] }
 0x74b   : > { %3610 = vmatprep.mubr.msk.f32.mxu0 %vm4292_vm0, %v4293_v38  ;;  %4015 = vmatpush3.bf16.msra.mxu0 %v4014_v35 }
 0x74c   : > { %4016 = vmatprep.subr.bf16.mxu0 %v4291_v3 }
 0x74f   : > { %4018 = vmatpush3.bf16.msra.mxu0 %v4017_v40 }
 0x750   : > { %4019 = vmatprep.subr.bf16.mxu0 %v4291_v3 }
 0x753   : > { %4021 = vmatpush3.bf16.msra.mxu0 %v4020_v51  ;;  %v2937_v51 = vld [vmem:[%s5467_s9 + $0x90] sm:$0xff] }
 0x754   : > { %4022 = vmatprep.subr.bf16.mxu0 %v4291_v3  ;;  %v4065_v56 = vpack.c.bf16 %v2938_v52, %v2937_v51 }
 0x757   : > { %4024 = vmatpush3.bf16.msra.mxu0 %v4023_v59  ;;  %v2939_v59 = vld [vmem:[%s5467_s9 + $0xa0] sm:$0xff] }
 0x758   : > { %4025 = vmatprep.subr.bf16.mxu0 %v4291_v3  ;;  %v4068_v1 = vpack.c.bf16 %v2940_v60, %v2939_v59 }
 0x75b   : > { %4027 = vmatpush3.bf16.msra.mxu0 %v4026_v8 }
 0x75c   : > { %4028 = vmatprep.subr.bf16.mxu0 %v4291_v3 }
 0x75f   : > { %4030 = vmatpush3.bf16.msra.mxu0 %v4029_v13  ;;  %v2943_v13 = vld [vmem:[%s5467_s9 + $0xc0] sm:$0xff] }
 0x760   : > { %4031 = vmatprep.subr.bf16.mxu0 %v4291_v3  ;;  %v4074_v15 = vpack.c.bf16 %v2944_v12, %v2943_v13  ;;  %v2964_v13 = vld [vmem:[%s5469_s11 + $0x28] sm:$0xff] }
 0x763   : > { %4033 = vmatpush3.bf16.msra.mxu0 %v4032_v20  ;;  %v2945_v20 = vld [vmem:[%s5467_s9 + $0xd0] sm:$0xff] }
 0x764   : > { %4034 = vmatprep.subr.bf16.mxu0 %v4291_v3  ;;  %v4077_v23 = vpack.c.bf16 %v2946_v21, %v2945_v20 }
 0x767   : > { %4036 = vmatpush3.bf16.msra.mxu0 %v4035_v26  ;;  %v2947_v26 = vld [vmem:[%s5467_s9 + $0xe0] sm:$0xff] }
 0x768   : > { %4061 = vmatprep.subr.bf16.mxu0 %v4291_v3 }
 0x81d   : > { %v1687_v42 = vpop.f32.mrb[10].mxu0 }
 0x81e   : > { %v1688_v43 = vadd.f32 %v2882_v41, %v1687_v42  ;;  %v3542_v44 = vpop.f32.mrb[11].mxu0  ;;  %v2920_v41 = vld [vmem:[%s5466_s8 + $0x88] sm:$0xff]  ;;  %v2935_v42 = vld [vmem:[%s5467_s9 + $0x80] sm:$0xff] }
 0x81f   : > { %v2886_v44 = vld [vmem:[%s5463_s5 + $0x1] ss:$0 sm:$0xff] }
 0x820   : > { %v4987_v45 = vadd.f32 %v1688_v43, %v4838_v7  ;;  %v3996_v7 = vpack.c.bf16 %v2892_v48, %v2891_v47  ;;  %v2936_v43 = vld [vmem:[%s5467_s9 + $0x88] sm:$0xff]  ;;  %v4038_v47 = vpack.c.bf16 %v2920_v41, %v2919_v39 }
 0x821   : > { %v4062_v48 = vpack.c.bf16 %v2936_v43, %v2935_v42 }
 0x822   : > { %1696 = vadd.xlane.f32.xlu1 %v4987_v45  ;;  %v1699_v46 = vmul.f32 %v4987_v45, %v4987_v45  ;;  %3997 = vmatpush3.bf16.msra.mxu1 %v3996_v7 }
 0x823   : > { %3998 = vmatprep.subr.bf16.mxu1 %v4291_v3 }
 0x824   : > { %1700 = vadd.xlane.f32.xlu0 %v1699_v46 }
 0x826   : > { %4000 = vmatpush3.bf16.msra.mxu1 %v3999_v57  ;;  %v2923_v57 = vld [vmem:[%s5466_s8 + $0xa0] sm:$0xff] }
 0x827   : > { %4001 = vmatprep.subr.bf16.mxu1 %v4291_v3  ;;  %v4044_v62 = vpack.c.bf16 %v2924_v58, %v2923_v57 }
 0x82a   : > { %4003 = vmatpush3.bf16.msra.mxu1 %v4002_v2  ;;  %v2925_v2 = vld [vmem:[%s5466_s8 + $0xb0] sm:$0xff] }
 0x82b   : > { %4004 = vmatprep.subr.bf16.mxu1 %v4291_v3  ;;  %v4047_v8 = vpack.c.bf16 %v2926_v4, %v2925_v2  ;;  %v2962_v4 = vld [vmem:[%s5468_s10 + $0x38] sm:$0xff] }
 0x82e   : > { %4006 = vmatpush3.bf16.msra.mxu1 %v4005_v11  ;;  %v2928_v11 = vld [vmem:[%s5466_s8 + $0xc8] sm:$0xff] }
 0x82f   : > { %4007 = vmatprep.subr.bf16.mxu1 %v4291_v3  ;;  %v4050_v14 = vpack.c.bf16 %v2928_v11, %v2927_v10  ;;  %v2963_v11 = vld [vmem:[%s5469_s11 + $0x20] sm:$0xff] }
 0x832   : > { %4009 = vmatpush3.bf16.msra.mxu1 %v4008_v18  ;;  %v2930_v18 = vld [vmem:[%s5466_s8 + $0xd8] sm:$0xff] }
 0x833   : > { %4010 = vmatprep.subr.bf16.mxu1 %v4291_v3  ;;  %v4053_v22 = vpack.c.bf16 %v2930_v18, %v2929_v16  ;;  %v2965_v16 = vld [vmem:[%s5469_s11 + $0x30] sm:$0xff]  ;;  %v2966_v18 = vld [vmem:[%s5469_s11 + $0x38] sm:$0xff] }
 0x834   : > { %v4109_v20 = vpack.c.bf16 %v2966_v18, %v2965_v16  ;;  %v3001_v18 = vld [vmem:[%s5475_s17 + $0xc0] sm:$0xff] }
 0x836   : > { %4012 = vmatpush3.bf16.msra.mxu1 %v4011_v25  ;;  %v2932_v25 = vld [vmem:[%s5466_s8 + $0xe8] sm:$0xff] }
 0x837   : > { %4037 = vmatprep.subr.bf16.mxu1 %v4291_v3 }
 0x8af   : > { %v1697_v27 = vpop.xlane.xlu1 %1696 }
 0x8b0   : > { %v1698_v28 = vmul.f32 0.03125, %v1697_v27  ;;  %v2948_v27 = vld [vmem:[%s5467_s9 + $0xe8] sm:$0xff] }
 0x8b1   : > { %v1701_v29 = vpop.xlane.xlu0 %1700 }
 0x8b2   : > { %v1703_v31 = vmul.f32 %v1698_v28, %v1698_v28  ;;  %v1702_v32 = vmul.f32 0.03125, %v1701_v29  ;;  %v1705_v35 = vsub.f32 %v4987_v45, %v1698_v28  ;;  %v4056_v28 = vpack.c.bf16 %v2932_v25, %v2931_v24  ;;  %v2975_v25 = vld [vmem:[%s5473_s15 + $0x80] sm:$0xff] }
 0x8b3   : > { %v4080_v29 = vpack.c.bf16 %v2948_v27, %v2947_v26  ;;  %v2976_v26 = vld [vmem:[%s5473_s15 + $0x88] sm:$0xff]  ;;  %v2977_v27 = vld [vmem:[%s5473_s15 + $0x90] sm:$0xff] }
 0x8b4   : > { %v1704_v33 = vsub.f32 %v1702_v32, %v1703_v31  ;;  %v2933_v31 = vld [vmem:[%s5466_s8 + $0xf0] sm:$0xff]  ;;  %v2934_v32 = vld [vmem:[%s5466_s8 + $0xf8] sm:$0xff] }
 0x8b6   : > { %v1706_v34 = vadd.f32 1e-05, %v1704_v33  ;;  %v2949_v33 = vld [vmem:[%s5467_s9 + $0xf0] sm:$0xff] }
 0x8b8   : > { %4217 = vrsqrt.f32 %v1706_v34  ;;  %v2950_v34 = vld [vmem:[%s5467_s9 + $0xf8] sm:$0xff] }
 0x8c2   : > { %v4218_v36 = vpop.eup %4217 }
 0x8c3   : > { %v1708_v40 = vmul.f32 %v4218_v36, %v1705_v35  ;;  %v4059_v35 = vpack.c.bf16 %v2934_v32, %v2933_v31  ;;  %v4083_v36 = vpack.c.bf16 %v2950_v34, %v2949_v33  ;;  %v2970_v32 = vld [vmem:[%s5470_s12 + $0x1] ss:$0 sm:$0xff] }
 0x8c5   : > { %v1715_v46 = vmul.f32 %v2885_v37, %v1708_v40 }
 0x8c7   : > { %v5098_v7 = vadd.f32 %v2886_v44, %v1715_v46 }
 0x8c9   : > { %3576 = vmatmul.mubr.f32.vlgmr.msra.gmra.mrb[12].mxu1 %v5098_v7  ;;  %3611 = vmatmul.mubr.f32.vlgmr.msra.gmra.mrb[12].mxu0 %v5098_v7 }
 0x8ca   : > { %4039 = vmatpush3.bf16.msra.mxu1 %v4038_v47  ;;  %4063 = vmatpush3.bf16.msra.mxu0 %v4062_v48 }
 0x8cb   : > { %4040 = vmatprep.subr.bf16.mxu1 %v4291_v3  ;;  %4064 = vmatprep.subr.bf16.mxu0 %v4291_v3 }
 0x8cc   : > { %3645 = vmatprep.mubr.msk.f32.mxu1 %vm4292_vm0, %v4293_v38  ;;  %3680 = vmatprep.mubr.msk.f32.mxu0 %vm4292_vm0, %v4293_v38 }
 0x8ce   : > { %4042 = vmatpush3.bf16.msra.mxu1 %v4041_v55  ;;  %4066 = vmatpush3.bf16.msra.mxu0 %v4065_v56 }
 0x8cf   : > { %4043 = vmatprep.subr.bf16.mxu1 %v4291_v3  ;;  %4067 = vmatprep.subr.bf16.mxu0 %v4291_v3 }
 0x8d2   : > { %4045 = vmatpush3.bf16.msra.mxu1 %v4044_v62  ;;  %4069 = vmatpush3.bf16.msra.mxu0 %v4068_v1 }
 0x8d3   : > { %4046 = vmatprep.subr.bf16.mxu1 %v4291_v3  ;;  %4070 = vmatprep.subr.bf16.mxu0 %v4291_v3 }
 0x8d6   : > { %4048 = vmatpush3.bf16.msra.mxu1 %v4047_v8  ;;  %4072 = vmatpush3.bf16.msra.mxu0 %v4071_v9 }
 0x8d7   : > { %4049 = vmatprep.subr.bf16.mxu1 %v4291_v3  ;;  %4073 = vmatprep.subr.bf16.mxu0 %v4291_v3 }
 0x8da   : > { %4051 = vmatpush3.bf16.msra.mxu1 %v4050_v14  ;;  %4075 = vmatpush3.bf16.msra.mxu0 %v4074_v15  ;;  %v4106_v14 = vpack.c.bf16 %v2964_v13, %v2963_v11  ;;  %v2997_v11 = vld [vmem:[%s5475_s17 + $0xa0] sm:$0xff]  ;;  %v2998_v13 = vld [vmem:[%s5475_s17 + $0xa8] sm:$0xff] }
 0x8db   : > { %4052 = vmatprep.subr.bf16.mxu1 %v4291_v3  ;;  %4076 = vmatprep.subr.bf16.mxu0 %v4291_v3 }
 0x8de   : > { %4054 = vmatpush3.bf16.msra.mxu1 %v4053_v22  ;;  %4078 = vmatpush3.bf16.msra.mxu0 %v4077_v23 }
 0x8df   : > { %4055 = vmatprep.subr.bf16.mxu1 %v4291_v3  ;;  %4079 = vmatprep.subr.bf16.mxu0 %v4291_v3 }
 0x8e2   : > { %4057 = vmatpush3.bf16.msra.mxu1 %v4056_v28  ;;  %4081 = vmatpush3.bf16.msra.mxu0 %v4080_v29  ;;  %v4118_v28 = vpack.c.bf16 %v2976_v26, %v2975_v25  ;;  %v2978_v29 = vld [vmem:[%s5473_s15 + $0x98] sm:$0xff]  ;;  %v3005_v25 = vld [vmem:[%s5475_s17 + $0xe0] sm:$0xff]  ;;  %v3006_v26 = vld [vmem:[%s5475_s17 + $0xe8] sm:$0xff] }
 0x8e3   : > { %4058 = vmatprep.subr.bf16.mxu1 %v4291_v3  ;;  %4082 = vmatprep.subr.bf16.mxu0 %v4291_v3 }
 0x8e6   : > { %4060 = vmatpush3.bf16.msra.mxu1 %v4059_v35  ;;  %4084 = vmatpush3.bf16.msra.mxu0 %v4083_v36 }
 0x8e7   : > { %4085 = vmatprep.subr.bf16.mxu1 %v4291_v3  ;;  %4093 = vmatprep.subr.bf16.mxu0 %v4291_v3 }
 0x8e9   : > { %3646 = vmatmul.mubr.f32.vlgmr.msra.gmra.mrb[14].mxu1 %v5098_v7  ;;  %3681 = vmatmul.mubr.f32.vlgmr.msra.gmra.mrb[14].mxu0 %v5098_v7 }
 0x8ea   : > { %3691 = vmatprep.mubr.msk.f32.mxu1 %vm4292_vm0, %v4293_v38  ;;  %4095 = vmatpush3.bf16.msra.mxu0 %v4754_v17 }
 0x8eb   : > { %4096 = vmatprep.subr.bf16.mxu0 %v4291_v3  ;;  %3702 = vmatprep.mubr.msk.f32.mxu0 %vm4292_vm0, %v4293_v38 }
 0x8ee   : > { %4098 = vmatpush3.bf16.msra.mxu0 %v4760_v19 }
 0x8ef   : > { %4099 = vmatprep.subr.bf16.mxu0 %v4291_v3 }
 0x99c   : > { %v1806_v37 = vpop.f32.mrb[12].mxu1  ;;  %v1893_v39 = vpop.f32.mrb[12].mxu0 }
 0x99d   : > { %v2071_v40 = vmul.f32 %v1893_v39, %v4707_v53  ;;  %v2072_v41 = vmul.f32 %v1893_v39, %v4712_v54  ;;  %v3577_v42 = vpop.f32.mrb[13].mxu1  ;;  %v3612_v43 = vpop.f32.mrb[13].mxu0  ;;  %v2073_v17 = vmul.f32 %v1893_v39, %v4725_v63  ;;  %v2074_v19 = vmul.f32 %v1893_v39, %v4730_v0  ;;  %v2979_v39 = vld [vmem:[%s5473_s15 + $0xa0] sm:$0xff] }
 0x99e   : > { %v2982_v42 = vld [vmem:[%s5473_s15 + $0xb8] sm:$0xff] }
 0x99f   : > { %v4086_v44 = vpack.c.bf16 %v2072_v41, %v2071_v40  ;;  %v4090_v46 = vpack.c.bf16 %v2074_v19, %v2073_v17  ;;  %v2980_v40 = vld [vmem:[%s5473_s15 + $0xa8] sm:$0xff]  ;;  %v2985_v19 = vld [vmem:[%s5473_s15 + $0xd0] sm:$0xff] }
 0x9a0   : > { %v4124_v41 = vpack.c.bf16 %v2980_v40, %v2979_v39  ;;  %v2984_v17 = vld [vmem:[%s5473_s15 + $0xc8] sm:$0xff] }
 0x9a1   : > { %4088 = vmatpush3.bf16.xpose.msk.msra.mxu1 %vm4718_vm2, %v4086_v44  ;;  %v2983_v44 = vld [vmem:[%s5473_s15 + $0xc0] sm:$0xff] }
 0x9a2   : > { %4089 = vmatprep.subr.bf16.mxu1 %v4291_v3 }
 0x9a9   : > { %4092 = vmatpush3.bf16.xpose.msk.msra.mxu1 %vm4718_vm2, %v4090_v46  ;;  %v4130_v46 = vpack.c.bf16 %v2984_v17, %v2983_v44  ;;  %v3010_v44 = vld [vmem:[%s5476_s18 + $0x1] ss:$0 sm:$0xff] }
 0x9aa   : > { %3716 = vmatprep.subr.mxu1 %v4293_v38 }
 0x9b0   : > { %3692 = vmatmul.mubr.msk.f32.vlgmr.msra.gmra.mrb[16].mxu1 %vm989_vm1, %v1806_v37 }
 0x9b1   : > { %3718 = vmatprep.mubr.msk.f32.mxu1 %vm4292_vm0, %v4293_v38 }
 0x9bc   : > { %v1980_v47 = vpop.f32.mrb[14].mxu1  ;;  %v2067_v48 = vpop.f32.mrb[14].mxu0 }
 0x9bd   : > { %v3647_v49 = vpop.f32.mrb[15].mxu1  ;;  %v3682_v7 = vpop.f32.mrb[15].mxu0  ;;  %3717 = vmatpush3.msra.mxu1 %v2067_v48  ;;  %v2075_v58 = vmul.f32 %v1980_v47, %v4707_v53  ;;  %v2076_v59 = vmul.f32 %v1980_v47, %v4712_v54  ;;  %v2077_v60 = vmul.f32 %v1980_v47, %v4725_v63  ;;  %v2078_v62 = vmul.f32 %v1980_v47, %v4730_v0  ;;  %v2959_v53 = vld [vmem:[%s5468_s10 + $0x20] sm:$0xff]  ;;  %v2960_v54 = vld [vmem:[%s5468_s10 + $0x28] sm:$0xff]  ;;  %v2961_v0 = vld [vmem:[%s5468_s10 + $0x30] sm:$0xff] }
 0x9be   : > { %3719 = vmatmul.mubr.msk.f32.vlgmr.msra.gmra.mrb[18].mxu1 %vm1230_vm3, %v4777_v30  ;;  %4111 = vmatprep.subr.bf16.mxu1 %v4291_v3  ;;  %v4112_v63 = vpack.c.bf16 %v2960_v54, %v2959_v53  ;;  %v4115_v6 = vpack.c.bf16 %v2962_v4, %v2961_v0  ;;  %v2986_v47 = vld [vmem:[%s5473_s15 + $0xd8] sm:$0xff]  ;;  %v2987_v49 = vld [vmem:[%s5473_s15 + $0xe0] sm:$0xff]  ;;  %v2988_v7 = vld [vmem:[%s5473_s15 + $0xe8] sm:$0xff] }
 0x9bf   : > { %3740 = vmatprep.mubr.msk.f32.mxu1 %vm4292_vm0, %v4293_v38  ;;  %v4100_v1 = vpack.c.bf16 %v2076_v59, %v2075_v58  ;;  %v4103_v2 = vpack.c.bf16 %v2078_v62, %v2077_v60  ;;  %v4133_v48 = vpack.c.bf16 %v2986_v47, %v2985_v19  ;;  %v2974_v4 = vld [vmem:[%s5472_s14 + $0x1] ss:$0 sm:$0xff] }
 0x9c0   : > { %4113 = vmatpush3.bf16.msra.mxu1 %v4112_v63  ;;  %v2973_v63 = vld [vmem:[%s5471_s13 + $0x1] ss:$0 sm:$0xff] }
 0x9c1   : > { %4114 = vmatprep.subr.bf16.mxu1 %v4291_v3 }
 0x9c4   : > { %4116 = vmatpush3.bf16.msra.mxu1 %v4115_v6 }
 0x9c5   : > { %4141 = vmatprep.subr.bf16.mxu1 %v4291_v3 }
 0xa83   : > { %v2160_v61 = vpop.f32.mrb[16].mxu1 }
 0xa84   : > { %v2164_v50 = vmul.f32 0.35355338, %v2160_v61  ;;  %v3693_v51 = vpop.f32.mrb[17].mxu1  ;;  %v4136_v61 = vpack.c.bf16 %v2988_v7, %v2987_v49 }
 0xa85   : > { %v2990_v51 = vld [vmem:[%s5473_s15 + $0xf8] sm:$0xff] }
 0xa86   : > { %v2165_v52 = vsel %vm989_vm1, %v2164_v50, -inf }
 0xa87   : > { %2166 = vmax.xlane.f32.xlu1 %v2165_v52 }
 0xa91   : > { %v2385_v5 = vpop.f32.mrb[18].mxu1 }
 0xa92   : > { %v3720_v8 = vpop.f32.mrb[19].mxu1 }
 0xa93   : > { %v2995_v8 = vld [vmem:[%s5475_s17 + $0x90] sm:$0xff] }
 0xb14   : > { %v2167_v55 = vpop.xlane.xlu1 %2166 }
 0xb15   : > { %v2168_v56 = vsub.f32 %v2164_v50, %v2167_v55  ;;  %v2989_v50 = vld [vmem:[%s5473_s15 + $0xf0] sm:$0xff]  ;;  %v2993_v55 = vld [vmem:[%s5475_s17 + $0x80] sm:$0xff] }
 0xb16   : > { %v4139_v52 = vpack.c.bf16 %v2990_v51, %v2989_v50 }
 0xb17   : > { %v2169_v57 = vmul.f32 1.442695, %v2168_v56  ;;  %v2994_v56 = vld [vmem:[%s5475_s17 + $0x88] sm:$0xff] }
 0xb19   : > { %4219 = vpow2.f32 %v2169_v57  ;;  %v4142_v57 = vpack.c.bf16 %v2994_v56, %v2993_v55 }
 0xb23   : > { %v4220_v30 = vpop.eup %4219 }
 0xb24   : > { %3703 = vmatmul.mubr.msk.f32.vlgmr.msra.gmra.mrb[16].mxu0 %vm989_vm1, %v4220_v30 }
 0xb25   : > { %4101 = vmatpush3.bf16.msra.mxu0 %v4100_v1  ;;  %3713 = vmatprep.mubr.msk.f32.mxu0 %vm4292_vm0, %v4293_v38 }
 0xb26   : > { %4102 = vmatprep.subr.bf16.mxu0 %v4291_v3 }
 0xb29   : > { %4104 = vmatpush3.bf16.msra.mxu0 %v4103_v2 }
 0xb2a   : > { %4105 = vmatprep.subr.bf16.mxu0 %v4291_v3 }
 0xbf7   : > { %v2240_v9 = vpop.f32.mrb[16].mxu0 }
 0xbf8   : > { %4221 = vrcp.f32 %v2240_v9  ;;  %v3704_v10 = vpop.f32.mrb[17].mxu0  ;;  %v2996_v9 = vld [vmem:[%s5475_s17 + $0x98] sm:$0xff] }
 0xbf9   : > { %v4145_v10 = vpack.c.bf16 %v2996_v9, %v2995_v8 }
 0xc02   : > { %v4222_v12 = vpop.eup %4221 }
 0xc03   : > { %v2245_v15 = vmul.f32 %v4222_v12, %v4220_v30  ;;  %v4148_v12 = vpack.c.bf16 %v2998_v13, %v2997_v11 }
 0xc05   : > { %3714 = vmatmul.mubr.msk.f32.vlgmr.msra.gmra.mrb[18].mxu0 %vm989_vm1, %v2245_v15  ;;  %v3000_v15 = vld [vmem:[%s5475_s17 + $0xb8] sm:$0xff] }
 0xc06   : > { %4107 = vmatpush3.bf16.msra.mxu0 %v4106_v14  ;;  %3729 = vmatprep.mubr.msk.f32.mxu0 %vm4292_vm0, %v4293_v38  ;;  %v2999_v14 = vld [vmem:[%s5475_s17 + $0xb0] sm:$0xff] }
 0xc07   : > { %4108 = vmatprep.subr.bf16.mxu0 %v4291_v3  ;;  %v4151_v16 = vpack.c.bf16 %v3000_v15, %v2999_v14 }
 0xc0a   : > { %4110 = vmatpush3.bf16.msra.mxu0 %v4109_v20  ;;  %v3002_v20 = vld [vmem:[%s5475_s17 + $0xc8] sm:$0xff] }
 0xc0b   : > { %4117 = vmatprep.subr.bf16.mxu0 %v4291_v3 }
 0xc0d   : > { %3730 = vmatmul.mubr.msk.f32.vlgmr.msra.gmra.mrb[20].mxu0 %vm989_vm1, %v2385_v5 }
 0xc0e   : > { %3775 = vmatprep.mubr.msk.f32.mxu0 %vm4292_vm0, %v4293_v38  ;;  %4119 = vmatpush3.bf16.msra.mxu0 %v4118_v28  ;;  %v3007_v28 = vld [vmem:[%s5475_s17 + $0xf0] sm:$0xff] }
 0xc0f   : > { %4120 = vmatprep.subr.bf16.mxu0 %v4291_v3 }
 0xcd8   : > { %v2315_v21 = vpop.f32.mrb[18].mxu0 }
 0xcd9   : > { %v3715_v22 = vpop.f32.mrb[19].mxu0  ;;  %3741 = vmatmul.mubr.msk.f32.vlgmr.msra.gmra.mrb[20].mxu1 %vm989_vm1, %v2315_v21  ;;  %v4154_v21 = vpack.c.bf16 %v3002_v20, %v3001_v18 }
 0xcda   : > { %3810 = vmatprep.mubr.msk.f32.mxu1 %vm4292_vm0, %v4293_v38  ;;  %v4121_v38 = vpack.c.bf16 %v2978_v29, %v2977_v27  ;;  %4143 = vmatpush3.bf16.msra.mxu1 %v4142_v57  ;;  %v3003_v22 = vld [vmem:[%s5475_s17 + $0xd0] sm:$0xff]  ;;  %v4160_v27 = vpack.c.bf16 %v3006_v26, %v3005_v25  ;;  %v3008_v29 = vld [vmem:[%s5475_s17 + $0xf8] sm:$0xff] }
 0xcdb   : > { %4144 = vmatprep.subr.bf16.mxu1 %v4291_v3 }
 0xcdc   : > { %4122 = vmatpush3.bf16.msra.mxu0 %v4121_v38  ;;  %v4163_v38 = vpack.c.bf16 %v3008_v29, %v3007_v28 }
 0xcdd   : > { %4123 = vmatprep.subr.bf16.mxu0 %v4291_v3 }
 0xcde   : > { %4146 = vmatpush3.bf16.msra.mxu1 %v4145_v10 }
 0xcdf   : > { %4147 = vmatprep.subr.bf16.mxu1 %v4291_v3 }
 0xce0   : > { %v2468_v23 = vpop.f32.mrb[20].mxu0  ;;  %4125 = vmatpush3.bf16.msra.mxu0 %v4124_v41 }
 0xce1   : > { %v3731_v24 = vpop.f32.mrb[21].mxu0  ;;  %4126 = vmatprep.subr.bf16.mxu0 %v4291_v3 }
 0xce2   : > { %4149 = vmatpush3.bf16.msra.mxu1 %v4148_v12 }
 0xce3   : > { %4150 = vmatprep.subr.bf16.mxu1 %v4291_v3 }
 0xce6   : > { %4152 = vmatpush3.bf16.msra.mxu1 %v4151_v16 }
 0xce7   : > { %4153 = vmatprep.subr.bf16.mxu1 %v4291_v3 }
 0xcea   : > { %4155 = vmatpush3.bf16.msra.mxu1 %v4154_v21 }
 0xceb   : > { %4156 = vmatprep.subr.bf16.mxu1 %v4291_v3 }
 0xdac   : > { %v2541_v31 = vpop.f32.mrb[20].mxu1 }
 0xdad   : > { %v2542_v33 = vadd.f32 %v2541_v31, %v2468_v23  ;;  %v3742_v34 = vpop.f32.mrb[21].mxu1  ;;  %v3004_v23 = vld [vmem:[%s5475_s17 + $0xd8] sm:$0xff]  ;;  %v2992_v31 = vld [vmem:[%s5474_s16 + $0x1] ss:$0 sm:$0xff] }
 0xdae   : > { %v4157_v24 = vpack.c.bf16 %v3004_v23, %v3003_v22 }
 0xdaf   : > { %v2553_v35 = vadd.f32 %v2970_v32, %v2542_v33 }
 0xdb0   : > { %4158 = vmatpush3.bf16.msra.mxu1 %v4157_v24 }
 0xdb1   : > { %v5296_v36 = vadd.f32 %v2553_v35, %v4987_v45  ;;  %v2981_v45 = vld [vmem:[%s5473_s15 + $0xb0] sm:$0xff]  ;;  %4159 = vmatprep.subr.bf16.mxu1 %v4291_v3 }
 0xdb2   : > { %v4127_v43 = vpack.c.bf16 %v2982_v42, %v2981_v45 }
 0xdb3   : > { %2559 = vadd.xlane.f32.xlu0 %v5296_v36  ;;  %v2562_v37 = vmul.f32 %v5296_v36, %v5296_v36 }
 0xdb4   : > { %4128 = vmatpush3.bf16.msra.mxu0 %v4127_v43  ;;  %4161 = vmatpush3.bf16.msra.mxu1 %v4160_v27 }
 0xdb5   : > { %2563 = vadd.xlane.f32.xlu1 %v2562_v37  ;;  %4129 = vmatprep.subr.bf16.mxu0 %v4291_v3 }
 0xdb6   : > { %4162 = vmatprep.subr.bf16.mxu1 %v4291_v3 }
 0xdb8   : > { %4131 = vmatpush3.bf16.msra.mxu0 %v4130_v46  ;;  %4164 = vmatpush3.bf16.msra.mxu1 %v4163_v38 }
 0xdb9   : > { %4132 = vmatprep.subr.bf16.mxu0 %v4291_v3 }
 0xdbc   : > { %4134 = vmatpush3.bf16.msra.mxu0 %v4133_v48 }
 0xdbd   : > { %4135 = vmatprep.subr.bf16.mxu0 %v4291_v3 }
 0xdc0   : > { %4137 = vmatpush3.bf16.msra.mxu0 %v4136_v61 }
 0xdc1   : > { %4138 = vmatprep.subr.bf16.mxu0 %v4291_v3 }
 0xdc4   : > { %4140 = vmatpush3.bf16.msra.mxu0 %v4139_v52 }
 0xe40   : > { %v2560_v58 = vpop.xlane.xlu0 %2559 }
 0xe41   : > { %v2561_v59 = vmul.f32 0.03125, %v2560_v58 }
 0xe42   : > { %v2564_v30 = vpop.xlane.xlu1 %2563 }
 0xe43   : > { %v2566_v60 = vmul.f32 %v2561_v59, %v2561_v59  ;;  %v2565_v62 = vmul.f32 0.03125, %v2564_v30  ;;  %v2568_v53 = vsub.f32 %v5296_v36, %v2561_v59 }
 0xe45   : > { %v2567_v1 = vsub.f32 %v2565_v62, %v2566_v60 }
 0xe47   : > { %v2569_v2 = vadd.f32 1e-05, %v2567_v1 }
 0xe49   : > { %4223 = vrsqrt.f32 %v2569_v2 }
 0xe53   : > { %v4224_v54 = vpop.eup %4223 }
 0xe54   : > { %v2571_v0 = vmul.f32 %v4224_v54, %v2568_v53 }
 0xe56   : > { %v2578_v5 = vmul.f32 %v2973_v63, %v2571_v0 }
 0xe58   : > { %v2585_v6 = vadd.f32 %v2974_v4, %v2578_v5 }
 0xe5a   : > { %3776 = vmatmul.mubr.f32.vlgmr.msra.gmra.mrb[22].mxu0 %v2585_v6 }
 0xf2d   : > { %v2677_v32 = vpop.f32.mrb[22].mxu0 }
 0xf2e   : > { %v2678_v33 = vadd.f32 %v2992_v31, %v2677_v32  ;;  %v3777_v34 = vpop.f32.mrb[23].mxu0 }
 0xf30   : > { %v2682_v35 = vmul.f32 0.044715, %v2678_v33  ;;  %v2681_v42 = vmul.f32 0.5, %v2678_v33 }
 0xf32   : > { %v2683_v37 = vmul.f32 %v2682_v35, %v2678_v33 }
 0xf34   : > { %v2684_v39 = vmul.f32 %v2683_v37, %v2678_v33 }
 0xf36   : > { %v2685_v40 = vadd.f32 %v2684_v39, %v2678_v33 }
 0xf38   : > { %v2686_v41 = vmul.f32 0.7978846, %v2685_v40 }
 0xf3a   : > { %4225 = vtanh.f32 %v2686_v41 }
 0xf44   : > { %v4226_v45 = vpop.eup %4225 }
 0xf45   : > { %v2688_v43 = vadd.f32 1.0, %v4226_v45 }
 0xf47   : > { %v2689_v3 = vmul.f32 %v2688_v43, %v2681_v42 }
 0xf49   : > { %3811 = vmatmul.mubr.f32.vlgmr.msra.gmra.mrb[22].mxu1 %v2689_v3 }
0x101c   : > { %v2781_v17 = vpop.f32.mrb[22].mxu1 }
0x101d   : > { %v2782_v19 = vadd.f32 %v3010_v44, %v2781_v17  ;;  %v3812_v46 = vpop.f32.mrb[23].mxu1 }
0x101f   : > { %v2785_v47 = vadd.f32 %v2782_v19, %v5296_v36 }
0x1021   : > { %2786 = vst [vmem:[%s593_s24] sm:$0xff] %v2785_v47 }
0x1022   : > { %4240 = shalt.err (!%p4237_p3)
}
0x1023   : > { %s4241_s2 = scalar_lea.hbm %s5416_s29, 128  ;;  %s4245_s25 = scalar_lea.hbm %s5477_s19, 256 }
0x1024   : > { %p4242_p4 = scmp.ne.s32.totalorder %s5416_s29, %s4241_s2  ;;  %p4246_p9 = scmp.lt.u32.totalorder %s5416_s29, %s5477_s19 }
0x1025   : > { %p4247_p10 = scmp.lt.u32.totalorder %s4245_s25, %s4241_s2  ;;  %p4249_p12 = scmp.lt.u32.totalorder %s4241_s2, %s5416_s29 }
0x1026   : > { %p4243_p7 = pnand %p4242_p4, %p4433_p5 }
0x1027   : > { %p4248_p11 = por %p4247_p10, %p4246_p9 }
0x1028   : > { %p4244_p8 = pneg %p4243_p7 }
0x1029   : > { %p4250_p13 = por %p4249_p12, %p4248_p11 }
0x102b   : > { %p4251_p0 = pnand %p4250_p13, %p4244_p8 }
0x102d   : > { %4254 = shalt.err (!%p4251_p0)
}
0x102e   : > { %4165 = dma.vmem_to_hbm [thread:$0]  (%p4433_p5), %s5418_s20, 128, %s5416_s29, %s2788_s0  }
0x102f PF: > { %s5505_s22 = sld [smem:[#allocation5_spill]]  ;;  %p4171_p1 = scmp.ge.s32.totalorder %s4289_s21, 2 }
0x1031   : > { %p4168_p2 = pnand %p4171_p1, %p4437_p6 }
0x1035   : > { %s2813_s27 = sand.u32 1, %s5505_s22  }
0x1036   : > { %s2814_s23 = scalar_lea.sflag [#allocation3], %s2813_s27 }
0x1037   : > { %4272 = dma.done.wait (!%p4168_p2), %s2814_s23, 128  }
0x1038   : > { %4274 = vsyncadd (!%p4168_p2), %s2814_s23, 4294967168  ;;  %s5507_s21 = sld [smem:[#allocation7_spill]]  ;;  %s5508_s2 = sld [smem:[#allocation6_spill]] }
0x1039   : > { %s5509_s20 = sld [smem:[#allocation8_spill]]  ;;  %s5510_s0 = smov %s4281_s30 }
0x103e   : > { %p29_p3 = scmp.ge.s32.totalorder %s5507_s21, 4   ;;  %s5511_s30 = smov %s5508_s2 }
0x1040   :  { %31 = sbr.rel (!%p29_p3) target bundleno = 8 (0x8), region = 146 }
0x1047   :  { %2819 = vsyncpa [#allocation3], 1 }
0x1048   :  { %2821 = vsyncpa [#allocation3 + $0x1], 1 }

</bundles_post_ra>
